<compile_context>
chip_gen: v7x
topology: tpu7x:2x2x1
jax: 0.10.0
libtpu: 0.0.40
codegen_flags: <defaults>
</compile_context>

<pallas_src>
import functools

import jax
import jax.numpy as jnp
from jax.experimental import pallas as pl
from jax.experimental.pallas import tpu as pltpu  # noqa: F401  (kept for parity)


# ----------------------------------------------------------------------------
# Fused autoencoder kernel (single invocation, everything resident in VMEM)
# ----------------------------------------------------------------------------
def _fused_autoencoder_kernel(
    x_ref,       # (B, T_enc*E)   batch-first, lane-dense input
    enc_ref,     # (E+H+1, 4H)    [W_ih^T ; W_hh^T ; b_ih+b_hh] encoder pack
    dec_ref,     # (H+E+1, 4E)    [W_ih^T ; W_hh^T ; b_ih+b_hh] decoder pack
    fc_ref,      # (E+1, E)       [W^T ; b] fc pack
    out_ref,     # (B, T_dec*E)   batch-first, lane-dense reconstruction
    *,
    batch,
    t_enc,
    t_dec,
    embed,
    hidden,
    use_bf16,
):
    B, T, E, H = batch, t_enc, embed, hidden

    def mm(a, w):
        # Optional bf16 cast of matmul operands (biggest win on v5e); accumulation
        # stays f32 via preferred_element_type.
        if use_bf16:
            a = a.astype(jnp.bfloat16)
            w = w.astype(jnp.bfloat16)
        return jnp.dot(a, w, preferred_element_type=jnp.float32)

    # ---- unpack coalesced operands with static, sublane-aligned slices ----
    ewih = enc_ref[0:E, :]                 # (E, 4H)
    ewhh = enc_ref[E:E + H, :]             # (H, 4H)
    eb   = enc_ref[E + H:E + H + 1, :]     # (1, 4H)

    dwih = dec_ref[0:H, :]                 # (H, 4E)
    dwhh = dec_ref[H:H + E, :]             # (E, 4E)
    db   = dec_ref[H + E:H + E + 1, :]     # (1, 4E)

    wfc  = fc_ref[0:E, :]                  # (E, E)
    bfc  = fc_ref[E:E + 1, :]              # (1, E)

    # -------------------- Encoder --------------------
    x = x_ref[...]                         # (B, T*E) loaded once

    # Per-step input projections; independent of h -> hoisted off the serial path.
    gx = [mm(x[:, t * E:(t + 1) * E], ewih) + eb for t in range(T)]   # T x (B, 4H)

    h = jnp.zeros((B, H), jnp.float32)
    c = jnp.zeros((B, H), jnp.float32)
    # Static unroll: only h @ W_hh sits on the serial critical path.
    for t in range(T):
        gates = gx[t] + mm(h, ewhh)                    # (B, 4H)
        sig = jax.nn.sigmoid(gates)                    # one EUP pass, full vreg
        th = jnp.tanh(gates)                           # one EUP pass, full vreg
        i = sig[:, 0 * H:1 * H]
        f = sig[:, 1 * H:2 * H]
        g = th[:, 2 * H:3 * H]
        o = sig[:, 3 * H:4 * H]
        c = f * c + i * g
        h = o * jnp.tanh(c)
    ctx = h                                            # (B, H) == hn[-1]

    # -------------------- Decoder --------------------
    # context.unsqueeze(1).repeat(1, T, 1): decoder input is the SAME (B, H) every
    # step, so its projection + bias is computed exactly once.
    dgx = mm(ctx, dwih) + db                           # (B, 4E)

    hd = jnp.zeros((B, E), jnp.float32)
    cd = jnp.zeros((B, E), jnp.float32)
    outs = []
    for _ in range(t_dec):
        gates = dgx + mm(hd, dwhh)                     # (B, 4E)
        sig = jax.nn.sigmoid(gates)
        th = jnp.tanh(gates)
        i = sig[:, 0 * E:1 * E]
        f = sig[:, 1 * E:2 * E]
        g = th[:, 2 * E:3 * E]
        o = sig[:, 3 * E:4 * E]
        cd = f * cd + i * g
        hd = o * jnp.tanh(cd)
        # fc applied per step on the in-register hidden state (no VMEM staging).
        outs.append(mm(hd, wfc) + bfc)                 # (B, E)

    # One lane-dense, full-block store of the whole reconstruction.
    out_ref[...] = jnp.concatenate(outs, axis=-1)      # (B, T_dec*E)


# ----------------------------------------------------------------------------
# Full autoencoder forward (jitted wrapper: layout only, single dispatch)
# ----------------------------------------------------------------------------
@functools.partial(jax.jit, static_argnames=("max_seq_length", "use_bf16"))
def lstm_autoencoder(params, x_bte, seq_length, max_seq_length, use_bf16=False):
    # seq_length is unused by the reference forward; kept for signature parity.
    del seq_length
    B, T, E = x_bte.shape
    T_dec = int(max_seq_length)
    H = params["enc_pack"].shape[0] - E - 1

    # batch_first (B, T, E) -> (B, T*E): contiguous reshape, no transpose, free under jit.
    x2d = x_bte.reshape(B, T * E)

    flops = (
        2 * T * B * E * 4 * H          # encoder input projections
        + 2 * T * B * H * 4 * H        # encoder recurrence
        + 2 * B * H * 4 * E            # decoder input projection (once)
        + 2 * T_dec * B * E * 4 * E    # decoder recurrence
        + 2 * T_dec * B * E * E        # fc
    )
    transcendentals = T * 9 * B * H + T_dec * 9 * B * E
    bytes_accessed = 4 * (
        B * T * E
        + (E + H + 1) * 4 * H
        + (H + E + 1) * 4 * E
        + (E + 1) * E
        + B * T_dec * E
    )

    kernel = functools.partial(
        _fused_autoencoder_kernel,
        batch=B, t_enc=T, t_dec=T_dec, embed=E, hidden=H, use_bf16=use_bf16,
    )
    out2d = pl.pallas_call(
        kernel,
        out_shape=jax.ShapeDtypeStruct((B, T_dec * E), jnp.float32),
        # no grid: whole (tiny) problem resident in VMEM for a single invocation
        cost_estimate=pl.CostEstimate(
            flops=flops,
            transcendentals=transcendentals,
            bytes_accessed=bytes_accessed,
        ),
    )(x2d, params["enc_pack"], params["dec_pack"], params["fc_pack"])

    # Contiguous reshape only; output is already batch-first.
    return out2d.reshape(B, T_dec, E)


# ----------------------------------------------------------------------------
# Pure-JAX reference (lax.scan) for validation
# ----------------------------------------------------------------------------
def _lstm_ref(x_tbe, wih_t, whh_t, bias, hidden):
    B = x_tbe.shape[1]

    def step(carry, x_t):
        h, c = carry
        gates = x_t @ wih_t + h @ whh_t + bias
        i, f, g, o = jnp.split(gates, 4, axis=-1)
        c = jax.nn.sigmoid(f) * c + jax.nn.sigmoid(i) * jnp.tanh(g)
        h = jax.nn.sigmoid(o) * jnp.tanh(c)
        return (h, c), h

    init = (jnp.zeros((B, hidden), jnp.float32), jnp.zeros((B, hidden), jnp.float32))
    (h, _), hs = jax.lax.scan(step, init, x_tbe)
    return h, hs


def autoencoder_ref(params, x_bte, max_seq_length):
    E = params["fc_pack"].shape[1]
    H = params["enc_pack"].shape[0] - E - 1
    enc, dec, fc = params["enc_pack"], params["dec_pack"], params["fc_pack"]
    ewih_t, ewhh_t, eb = enc[:E], enc[E:E + H], enc[E + H]
    dwih_t, dwhh_t, db = dec[:H], dec[H:H + E], dec[H + E]
    wfc_t, bfc = fc[:E], fc[E]

    x_tbe = jnp.transpose(x_bte, (1, 0, 2))
    ctx, _ = _lstm_ref(x_tbe, ewih_t, ewhh_t, eb, H)
    ctx_rep = jnp.broadcast_to(ctx[None], (max_seq_length,) + ctx.shape)
    _, hs = _lstm_ref(ctx_rep, dwih_t, dwhh_t, db, E)
    out = hs @ wfc_t + bfc
    return jnp.transpose(out, (1, 0, 2))


# ----------------------------------------------------------------------------
# Deterministic parameter init (shapes follow nn.LSTM / nn.Linear in the module),
# packed into 3 coalesced operands for the kernel.
# ----------------------------------------------------------------------------
def init_params(key, embedding_dim, hidden_dim):
    E, H = embedding_dim, hidden_dim
    ks = jax.random.split(key, 10)
    scale = 0.1

    # Encoder: nn.LSTM(E, H) -> weight_ih (4H, E), weight_hh (4H, H), biases (4H,)
    enc_wih = scale * jax.random.normal(ks[0], (4 * H, E), jnp.float32)
    enc_whh = scale * jax.random.normal(ks[1], (4 * H, H), jnp.float32)
    enc_bih = scale * jax.random.normal(ks[2], (4 * H,), jnp.float32)
    enc_bhh = scale * jax.random.normal(ks[3], (4 * H,), jnp.float32)

    # Decoder: nn.LSTM(H, E) -> weight_ih (4E, H), weight_hh (4E, E), biases (4E,)
    dec_wih = scale * jax.random.normal(ks[4], (4 * E, H), jnp.float32)
    dec_whh = scale * jax.random.normal(ks[5], (4 * E, E), jnp.float32)
    dec_bih = scale * jax.random.normal(ks[6], (4 * E,), jnp.float32)
    dec_bhh = scale * jax.random.normal(ks[7], (4 * E,), jnp.float32)

    # fc: nn.Linear(E, E) -> weight (E, E), bias (E,)
    fc_w = scale * jax.random.normal(ks[8], (E, E), jnp.float32)
    fc_b = scale * jax.random.normal(ks[9], (E,), jnp.float32)

    return {
        # [W_ih^T ; W_hh^T ; b_ih + b_hh] packed along rows (sublane-aligned slices)
        "enc_pack": jnp.concatenate(
            [enc_wih.T, enc_whh.T, (enc_bih + enc_bhh)[None, :]], axis=0),   # (E+H+1, 4H)
        "dec_pack": jnp.concatenate(
            [dec_wih.T, dec_whh.T, (dec_bih + dec_bhh)[None, :]], axis=0),   # (H+E+1, 4E)
        "fc_pack": jnp.concatenate([fc_w.T, fc_b[None, :]], axis=0),         # (E+1, E)
    }


if __name__ == "__main__":
    B, T, E, H = 2, 8, 16, 32      # batch, seq, embedding_dim, hidden_dim (super_mater)
    key = jax.random.PRNGKey(0)
    k_x, k_p = jax.random.split(key)

    params = init_params(k_p, E, H)
    x = jax.random.normal(k_x, (B, T, E), jnp.float32)   # batch_first, like torch input
    seq_length = jnp.full((B,), T, jnp.int32)             # unused by forward, parity only
    max_seq_length = T

    out = lstm_autoencoder(params, x, seq_length, max_seq_length)
    out = jax.block_until_ready(out)

    ref = autoencoder_ref(params, x, max_seq_length)
    assert out.shape == (B, T, E), out.shape
    assert jnp.allclose(out, ref, atol=2e-5, rtol=1e-5), \
        float(jnp.max(jnp.abs(out - ref)))

    print("KERNEL_OK")
</pallas_src>

<mosaic_0001>
module attributes {stable_mosaic.version = 11 : i64} {
  func.func @_fused_autoencoder_kernel(%arg0: memref<2x128xf32, #tpu.memory_space<vmem>>, %arg1: memref<49x128xf32, #tpu.memory_space<vmem>>, %arg2: memref<49x64xf32, #tpu.memory_space<vmem>>, %arg3: memref<17x16xf32, #tpu.memory_space<vmem>>, %arg4: memref<2x128xf32, #tpu.memory_space<vmem>>) attributes {dimension_semantics = [], scalar_prefetch = 0 : i64, scratch_operands = 0 : i64, tpu.core_type = #tpu.core_type<tc>} {
    %c0 = arith.constant 0 : index
    %c0_0 = arith.constant 0 : index
    %0 = vector.load %arg1[%c0, %c0_0] : memref<49x128xf32, #tpu.memory_space<vmem>>, vector<16x128xf32>
    %c16 = arith.constant 16 : index
    %c0_1 = arith.constant 0 : index
    %1 = vector.load %arg1[%c16, %c0_1] : memref<49x128xf32, #tpu.memory_space<vmem>>, vector<32x128xf32>
    %c48 = arith.constant 48 : index
    %c0_2 = arith.constant 0 : index
    %2 = vector.load %arg1[%c48, %c0_2] : memref<49x128xf32, #tpu.memory_space<vmem>>, vector<1x128xf32>
    %c0_3 = arith.constant 0 : index
    %c0_4 = arith.constant 0 : index
    %3 = vector.load %arg2[%c0_3, %c0_4] : memref<49x64xf32, #tpu.memory_space<vmem>>, vector<32x64xf32>
    %c32 = arith.constant 32 : index
    %c0_5 = arith.constant 0 : index
    %4 = vector.load %arg2[%c32, %c0_5] : memref<49x64xf32, #tpu.memory_space<vmem>>, vector<16x64xf32>
    %c48_6 = arith.constant 48 : index
    %c0_7 = arith.constant 0 : index
    %5 = vector.load %arg2[%c48_6, %c0_7] : memref<49x64xf32, #tpu.memory_space<vmem>>, vector<1x64xf32>
    %c0_8 = arith.constant 0 : index
    %c0_9 = arith.constant 0 : index
    %6 = vector.load %arg3[%c0_8, %c0_9] : memref<17x16xf32, #tpu.memory_space<vmem>>, vector<16x16xf32>
    %c16_10 = arith.constant 16 : index
    %c0_11 = arith.constant 0 : index
    %7 = vector.load %arg3[%c16_10, %c0_11] : memref<17x16xf32, #tpu.memory_space<vmem>>, vector<1x16xf32>
    %c0_12 = arith.constant 0 : index
    %c0_13 = arith.constant 0 : index
    %8 = vector.load %arg0[%c0_12, %c0_13] : memref<2x128xf32, #tpu.memory_space<vmem>>, vector<2x128xf32>
    %9 = vector.extract_strided_slice %8 {offsets = [0, 0], sizes = [2, 16], strides = [1, 1]} : vector<2x128xf32> to vector<2x16xf32>
    %cst = arith.constant dense<0.000000e+00> : vector<2x128xf32>
    %10 = tpu.matmul %9, %0, %cst {dimension_numbers = #tpu.dot_dimension_numbers<[1], [0], [0], [1], [0, 0, 1, 1], [], []>} : vector<2x16xf32>, vector<16x128xf32>, vector<2x128xf32> -> vector<2x128xf32>
    %11 = vector.broadcast %2 : vector<1x128xf32> to vector<2x128xf32>
    %12 = arith.addf %10, %11 : vector<2x128xf32>
    %13 = vector.extract_strided_slice %8 {offsets = [0, 16], sizes = [2, 16], strides = [1, 1]} : vector<2x128xf32> to vector<2x16xf32>
    %cst_14 = arith.constant dense<0.000000e+00> : vector<2x128xf32>
    %14 = tpu.matmul %13, %0, %cst_14 {dimension_numbers = #tpu.dot_dimension_numbers<[1], [0], [0], [1], [0, 0, 1, 1], [], []>} : vector<2x16xf32>, vector<16x128xf32>, vector<2x128xf32> -> vector<2x128xf32>
    %15 = vector.broadcast %2 : vector<1x128xf32> to vector<2x128xf32>
    %16 = arith.addf %14, %15 : vector<2x128xf32>
    %17 = vector.extract_strided_slice %8 {offsets = [0, 32], sizes = [2, 16], strides = [1, 1]} : vector<2x128xf32> to vector<2x16xf32>
    %cst_15 = arith.constant dense<0.000000e+00> : vector<2x128xf32>
    %18 = tpu.matmul %17, %0, %cst_15 {dimension_numbers = #tpu.dot_dimension_numbers<[1], [0], [0], [1], [0, 0, 1, 1], [], []>} : vector<2x16xf32>, vector<16x128xf32>, vector<2x128xf32> -> vector<2x128xf32>
    %19 = vector.broadcast %2 : vector<1x128xf32> to vector<2x128xf32>
    %20 = arith.addf %18, %19 : vector<2x128xf32>
    %21 = vector.extract_strided_slice %8 {offsets = [0, 48], sizes = [2, 16], strides = [1, 1]} : vector<2x128xf32> to vector<2x16xf32>
    %cst_16 = arith.constant dense<0.000000e+00> : vector<2x128xf32>
    %22 = tpu.matmul %21, %0, %cst_16 {dimension_numbers = #tpu.dot_dimension_numbers<[1], [0], [0], [1], [0, 0, 1, 1], [], []>} : vector<2x16xf32>, vector<16x128xf32>, vector<2x128xf32> -> vector<2x128xf32>
    %23 = vector.broadcast %2 : vector<1x128xf32> to vector<2x128xf32>
    %24 = arith.addf %22, %23 : vector<2x128xf32>
    %25 = vector.extract_strided_slice %8 {offsets = [0, 64], sizes = [2, 16], strides = [1, 1]} : vector<2x128xf32> to vector<2x16xf32>
    %cst_17 = arith.constant dense<0.000000e+00> : vector<2x128xf32>
    %26 = tpu.matmul %25, %0, %cst_17 {dimension_numbers = #tpu.dot_dimension_numbers<[1], [0], [0], [1], [0, 0, 1, 1], [], []>} : vector<2x16xf32>, vector<16x128xf32>, vector<2x128xf32> -> vector<2x128xf32>
    %27 = vector.broadcast %2 : vector<1x128xf32> to vector<2x128xf32>
    %28 = arith.addf %26, %27 : vector<2x128xf32>
    %29 = vector.extract_strided_slice %8 {offsets = [0, 80], sizes = [2, 16], strides = [1, 1]} : vector<2x128xf32> to vector<2x16xf32>
    %cst_18 = arith.constant dense<0.000000e+00> : vector<2x128xf32>
    %30 = tpu.matmul %29, %0, %cst_18 {dimension_numbers = #tpu.dot_dimension_numbers<[1], [0], [0], [1], [0, 0, 1, 1], [], []>} : vector<2x16xf32>, vector<16x128xf32>, vector<2x128xf32> -> vector<2x128xf32>
    %31 = vector.broadcast %2 : vector<1x128xf32> to vector<2x128xf32>
    %32 = arith.addf %30, %31 : vector<2x128xf32>
    %33 = vector.extract_strided_slice %8 {offsets = [0, 96], sizes = [2, 16], strides = [1, 1]} : vector<2x128xf32> to vector<2x16xf32>
    %cst_19 = arith.constant dense<0.000000e+00> : vector<2x128xf32>
    %34 = tpu.matmul %33, %0, %cst_19 {dimension_numbers = #tpu.dot_dimension_numbers<[1], [0], [0], [1], [0, 0, 1, 1], [], []>} : vector<2x16xf32>, vector<16x128xf32>, vector<2x128xf32> -> vector<2x128xf32>
    %35 = vector.broadcast %2 : vector<1x128xf32> to vector<2x128xf32>
    %36 = arith.addf %34, %35 : vector<2x128xf32>
    %37 = vector.extract_strided_slice %8 {offsets = [0, 112], sizes = [2, 16], strides = [1, 1]} : vector<2x128xf32> to vector<2x16xf32>
    %cst_20 = arith.constant dense<0.000000e+00> : vector<2x128xf32>
    %38 = tpu.matmul %37, %0, %cst_20 {dimension_numbers = #tpu.dot_dimension_numbers<[1], [0], [0], [1], [0, 0, 1, 1], [], []>} : vector<2x16xf32>, vector<16x128xf32>, vector<2x128xf32> -> vector<2x128xf32>
    %39 = vector.broadcast %2 : vector<1x128xf32> to vector<2x128xf32>
    %40 = arith.addf %38, %39 : vector<2x128xf32>
    %cst_21 = arith.constant 0.000000e+00 : f32
    %41 = vector.broadcast %cst_21 : f32 to vector<2x32xf32>
    %cst_22 = arith.constant 0.000000e+00 : f32
    %42 = vector.broadcast %cst_22 : f32 to vector<2x32xf32>
    %cst_23 = arith.constant dense<0.000000e+00> : vector<2x128xf32>
    %43 = tpu.matmul %41, %1, %cst_23 {dimension_numbers = #tpu.dot_dimension_numbers<[1], [0], [0], [1], [0, 0, 1, 1], [], []>} : vector<2x32xf32>, vector<32x128xf32>, vector<2x128xf32> -> vector<2x128xf32>
    %44 = arith.addf %12, %43 : vector<2x128xf32>
    %45 = arith.negf %44 : vector<2x128xf32>
    %46 = math.exp %45 : vector<2x128xf32>
    %cst_24 = arith.constant 1.000000e+00 : f32
    %47 = vector.broadcast %cst_24 : f32 to vector<2x128xf32>
    %48 = arith.addf %47, %46 : vector<2x128xf32>
    %49 = arith.divf %47, %48 : vector<2x128xf32>
    %50 = math.tanh %44 : vector<2x128xf32>
    %51 = vector.extract_strided_slice %49 {offsets = [0, 0], sizes = [2, 32], strides = [1, 1]} : vector<2x128xf32> to vector<2x32xf32>
    %52 = vector.extract_strided_slice %49 {offsets = [0, 32], sizes = [2, 32], strides = [1, 1]} : vector<2x128xf32> to vector<2x32xf32>
    %53 = vector.extract_strided_slice %50 {offsets = [0, 64], sizes = [2, 32], strides = [1, 1]} : vector<2x128xf32> to vector<2x32xf32>
    %54 = vector.extract_strided_slice %49 {offsets = [0, 96], sizes = [2, 32], strides = [1, 1]} : vector<2x128xf32> to vector<2x32xf32>
    %55 = arith.mulf %52, %42 : vector<2x32xf32>
    %56 = arith.mulf %51, %53 : vector<2x32xf32>
    %57 = arith.addf %55, %56 : vector<2x32xf32>
    %58 = math.tanh %57 : vector<2x32xf32>
    %59 = arith.mulf %54, %58 : vector<2x32xf32>
    %cst_25 = arith.constant dense<0.000000e+00> : vector<2x128xf32>
    %60 = tpu.matmul %59, %1, %cst_25 {dimension_numbers = #tpu.dot_dimension_numbers<[1], [0], [0], [1], [0, 0, 1, 1], [], []>} : vector<2x32xf32>, vector<32x128xf32>, vector<2x128xf32> -> vector<2x128xf32>
    %61 = arith.addf %16, %60 : vector<2x128xf32>
    %62 = arith.negf %61 : vector<2x128xf32>
    %63 = math.exp %62 : vector<2x128xf32>
    %cst_26 = arith.constant 1.000000e+00 : f32
    %64 = vector.broadcast %cst_26 : f32 to vector<2x128xf32>
    %65 = arith.addf %64, %63 : vector<2x128xf32>
    %66 = arith.divf %64, %65 : vector<2x128xf32>
    %67 = math.tanh %61 : vector<2x128xf32>
    %68 = vector.extract_strided_slice %66 {offsets = [0, 0], sizes = [2, 32], strides = [1, 1]} : vector<2x128xf32> to vector<2x32xf32>
    %69 = vector.extract_strided_slice %66 {offsets = [0, 32], sizes = [2, 32], strides = [1, 1]} : vector<2x128xf32> to vector<2x32xf32>
    %70 = vector.extract_strided_slice %67 {offsets = [0, 64], sizes = [2, 32], strides = [1, 1]} : vector<2x128xf32> to vector<2x32xf32>
    %71 = vector.extract_strided_slice %66 {offsets = [0, 96], sizes = [2, 32], strides = [1, 1]} : vector<2x128xf32> to vector<2x32xf32>
    %72 = arith.mulf %69, %57 : vector<2x32xf32>
    %73 = arith.mulf %68, %70 : vector<2x32xf32>
    %74 = arith.addf %72, %73 : vector<2x32xf32>
    %75 = math.tanh %74 : vector<2x32xf32>
    %76 = arith.mulf %71, %75 : vector<2x32xf32>
    %cst_27 = arith.constant dense<0.000000e+00> : vector<2x128xf32>
    %77 = tpu.matmul %76, %1, %cst_27 {dimension_numbers = #tpu.dot_dimension_numbers<[1], [0], [0], [1], [0, 0, 1, 1], [], []>} : vector<2x32xf32>, vector<32x128xf32>, vector<2x128xf32> -> vector<2x128xf32>
    %78 = arith.addf %20, %77 : vector<2x128xf32>
    %79 = arith.negf %78 : vector<2x128xf32>
    %80 = math.exp %79 : vector<2x128xf32>
    %cst_28 = arith.constant 1.000000e+00 : f32
    %81 = vector.broadcast %cst_28 : f32 to vector<2x128xf32>
    %82 = arith.addf %81, %80 : vector<2x128xf32>
    %83 = arith.divf %81, %82 : vector<2x128xf32>
    %84 = math.tanh %78 : vector<2x128xf32>
    %85 = vector.extract_strided_slice %83 {offsets = [0, 0], sizes = [2, 32], strides = [1, 1]} : vector<2x128xf32> to vector<2x32xf32>
    %86 = vector.extract_strided_slice %83 {offsets = [0, 32], sizes = [2, 32], strides = [1, 1]} : vector<2x128xf32> to vector<2x32xf32>
    %87 = vector.extract_strided_slice %84 {offsets = [0, 64], sizes = [2, 32], strides = [1, 1]} : vector<2x128xf32> to vector<2x32xf32>
    %88 = vector.extract_strided_slice %83 {offsets = [0, 96], sizes = [2, 32], strides = [1, 1]} : vector<2x128xf32> to vector<2x32xf32>
    %89 = arith.mulf %86, %74 : vector<2x32xf32>
    %90 = arith.mulf %85, %87 : vector<2x32xf32>
    %91 = arith.addf %89, %90 : vector<2x32xf32>
    %92 = math.tanh %91 : vector<2x32xf32>
    %93 = arith.mulf %88, %92 : vector<2x32xf32>
    %cst_29 = arith.constant dense<0.000000e+00> : vector<2x128xf32>
    %94 = tpu.matmul %93, %1, %cst_29 {dimension_numbers = #tpu.dot_dimension_numbers<[1], [0], [0], [1], [0, 0, 1, 1], [], []>} : vector<2x32xf32>, vector<32x128xf32>, vector<2x128xf32> -> vector<2x128xf32>
    %95 = arith.addf %24, %94 : vector<2x128xf32>
    %96 = arith.negf %95 : vector<2x128xf32>
    %97 = math.exp %96 : vector<2x128xf32>
    %cst_30 = arith.constant 1.000000e+00 : f32
    %98 = vector.broadcast %cst_30 : f32 to vector<2x128xf32>
    %99 = arith.addf %98, %97 : vector<2x128xf32>
    %100 = arith.divf %98, %99 : vector<2x128xf32>
    %101 = math.tanh %95 : vector<2x128xf32>
    %102 = vector.extract_strided_slice %100 {offsets = [0, 0], sizes = [2, 32], strides = [1, 1]} : vector<2x128xf32> to vector<2x32xf32>
    %103 = vector.extract_strided_slice %100 {offsets = [0, 32], sizes = [2, 32], strides = [1, 1]} : vector<2x128xf32> to vector<2x32xf32>
    %104 = vector.extract_strided_slice %101 {offsets = [0, 64], sizes = [2, 32], strides = [1, 1]} : vector<2x128xf32> to vector<2x32xf32>
    %105 = vector.extract_strided_slice %100 {offsets = [0, 96], sizes = [2, 32], strides = [1, 1]} : vector<2x128xf32> to vector<2x32xf32>
    %106 = arith.mulf %103, %91 : vector<2x32xf32>
    %107 = arith.mulf %102, %104 : vector<2x32xf32>
    %108 = arith.addf %106, %107 : vector<2x32xf32>
    %109 = math.tanh %108 : vector<2x32xf32>
    %110 = arith.mulf %105, %109 : vector<2x32xf32>
    %cst_31 = arith.constant dense<0.000000e+00> : vector<2x128xf32>
    %111 = tpu.matmul %110, %1, %cst_31 {dimension_numbers = #tpu.dot_dimension_numbers<[1], [0], [0], [1], [0, 0, 1, 1], [], []>} : vector<2x32xf32>, vector<32x128xf32>, vector<2x128xf32> -> vector<2x128xf32>
    %112 = arith.addf %28, %111 : vector<2x128xf32>
    %113 = arith.negf %112 : vector<2x128xf32>
    %114 = math.exp %113 : vector<2x128xf32>
    %cst_32 = arith.constant 1.000000e+00 : f32
    %115 = vector.broadcast %cst_32 : f32 to vector<2x128xf32>
    %116 = arith.addf %115, %114 : vector<2x128xf32>
    %117 = arith.divf %115, %116 : vector<2x128xf32>
    %118 = math.tanh %112 : vector<2x128xf32>
    %119 = vector.extract_strided_slice %117 {offsets = [0, 0], sizes = [2, 32], strides = [1, 1]} : vector<2x128xf32> to vector<2x32xf32>
    %120 = vector.extract_strided_slice %117 {offsets = [0, 32], sizes = [2, 32], strides = [1, 1]} : vector<2x128xf32> to vector<2x32xf32>
    %121 = vector.extract_strided_slice %118 {offsets = [0, 64], sizes = [2, 32], strides = [1, 1]} : vector<2x128xf32> to vector<2x32xf32>
    %122 = vector.extract_strided_slice %117 {offsets = [0, 96], sizes = [2, 32], strides = [1, 1]} : vector<2x128xf32> to vector<2x32xf32>
    %123 = arith.mulf %120, %108 : vector<2x32xf32>
    %124 = arith.mulf %119, %121 : vector<2x32xf32>
    %125 = arith.addf %123, %124 : vector<2x32xf32>
    %126 = math.tanh %125 : vector<2x32xf32>
    %127 = arith.mulf %122, %126 : vector<2x32xf32>
    %cst_33 = arith.constant dense<0.000000e+00> : vector<2x128xf32>
    %128 = tpu.matmul %127, %1, %cst_33 {dimension_numbers = #tpu.dot_dimension_numbers<[1], [0], [0], [1], [0, 0, 1, 1], [], []>} : vector<2x32xf32>, vector<32x128xf32>, vector<2x128xf32> -> vector<2x128xf32>
    %129 = arith.addf %32, %128 : vector<2x128xf32>
    %130 = arith.negf %129 : vector<2x128xf32>
    %131 = math.exp %130 : vector<2x128xf32>
    %cst_34 = arith.constant 1.000000e+00 : f32
    %132 = vector.broadcast %cst_34 : f32 to vector<2x128xf32>
    %133 = arith.addf %132, %131 : vector<2x128xf32>
    %134 = arith.divf %132, %133 : vector<2x128xf32>
    %135 = math.tanh %129 : vector<2x128xf32>
    %136 = vector.extract_strided_slice %134 {offsets = [0, 0], sizes = [2, 32], strides = [1, 1]} : vector<2x128xf32> to vector<2x32xf32>
    %137 = vector.extract_strided_slice %134 {offsets = [0, 32], sizes = [2, 32], strides = [1, 1]} : vector<2x128xf32> to vector<2x32xf32>
    %138 = vector.extract_strided_slice %135 {offsets = [0, 64], sizes = [2, 32], strides = [1, 1]} : vector<2x128xf32> to vector<2x32xf32>
    %139 = vector.extract_strided_slice %134 {offsets = [0, 96], sizes = [2, 32], strides = [1, 1]} : vector<2x128xf32> to vector<2x32xf32>
    %140 = arith.mulf %137, %125 : vector<2x32xf32>
    %141 = arith.mulf %136, %138 : vector<2x32xf32>
    %142 = arith.addf %140, %141 : vector<2x32xf32>
    %143 = math.tanh %142 : vector<2x32xf32>
    %144 = arith.mulf %139, %143 : vector<2x32xf32>
    %cst_35 = arith.constant dense<0.000000e+00> : vector<2x128xf32>
    %145 = tpu.matmul %144, %1, %cst_35 {dimension_numbers = #tpu.dot_dimension_numbers<[1], [0], [0], [1], [0, 0, 1, 1], [], []>} : vector<2x32xf32>, vector<32x128xf32>, vector<2x128xf32> -> vector<2x128xf32>
    %146 = arith.addf %36, %145 : vector<2x128xf32>
    %147 = arith.negf %146 : vector<2x128xf32>
    %148 = math.exp %147 : vector<2x128xf32>
    %cst_36 = arith.constant 1.000000e+00 : f32
    %149 = vector.broadcast %cst_36 : f32 to vector<2x128xf32>
    %150 = arith.addf %149, %148 : vector<2x128xf32>
    %151 = arith.divf %149, %150 : vector<2x128xf32>
    %152 = math.tanh %146 : vector<2x128xf32>
    %153 = vector.extract_strided_slice %151 {offsets = [0, 0], sizes = [2, 32], strides = [1, 1]} : vector<2x128xf32> to vector<2x32xf32>
    %154 = vector.extract_strided_slice %151 {offsets = [0, 32], sizes = [2, 32], strides = [1, 1]} : vector<2x128xf32> to vector<2x32xf32>
    %155 = vector.extract_strided_slice %152 {offsets = [0, 64], sizes = [2, 32], strides = [1, 1]} : vector<2x128xf32> to vector<2x32xf32>
    %156 = vector.extract_strided_slice %151 {offsets = [0, 96], sizes = [2, 32], strides = [1, 1]} : vector<2x128xf32> to vector<2x32xf32>
    %157 = arith.mulf %154, %142 : vector<2x32xf32>
    %158 = arith.mulf %153, %155 : vector<2x32xf32>
    %159 = arith.addf %157, %158 : vector<2x32xf32>
    %160 = math.tanh %159 : vector<2x32xf32>
    %161 = arith.mulf %156, %160 : vector<2x32xf32>
    %cst_37 = arith.constant dense<0.000000e+00> : vector<2x128xf32>
    %162 = tpu.matmul %161, %1, %cst_37 {dimension_numbers = #tpu.dot_dimension_numbers<[1], [0], [0], [1], [0, 0, 1, 1], [], []>} : vector<2x32xf32>, vector<32x128xf32>, vector<2x128xf32> -> vector<2x128xf32>
    %163 = arith.addf %40, %162 : vector<2x128xf32>
    %164 = arith.negf %163 : vector<2x128xf32>
    %165 = math.exp %164 : vector<2x128xf32>
    %cst_38 = arith.constant 1.000000e+00 : f32
    %166 = vector.broadcast %cst_38 : f32 to vector<2x128xf32>
    %167 = arith.addf %166, %165 : vector<2x128xf32>
    %168 = arith.divf %166, %167 : vector<2x128xf32>
    %169 = math.tanh %163 : vector<2x128xf32>
    %170 = vector.extract_strided_slice %168 {offsets = [0, 0], sizes = [2, 32], strides = [1, 1]} : vector<2x128xf32> to vector<2x32xf32>
    %171 = vector.extract_strided_slice %168 {offsets = [0, 32], sizes = [2, 32], strides = [1, 1]} : vector<2x128xf32> to vector<2x32xf32>
    %172 = vector.extract_strided_slice %169 {offsets = [0, 64], sizes = [2, 32], strides = [1, 1]} : vector<2x128xf32> to vector<2x32xf32>
    %173 = vector.extract_strided_slice %168 {offsets = [0, 96], sizes = [2, 32], strides = [1, 1]} : vector<2x128xf32> to vector<2x32xf32>
    %174 = arith.mulf %171, %159 : vector<2x32xf32>
    %175 = arith.mulf %170, %172 : vector<2x32xf32>
    %176 = arith.addf %174, %175 : vector<2x32xf32>
    %177 = math.tanh %176 : vector<2x32xf32>
    %178 = arith.mulf %173, %177 : vector<2x32xf32>
    %cst_39 = arith.constant dense<0.000000e+00> : vector<2x64xf32>
    %179 = tpu.matmul %178, %3, %cst_39 {dimension_numbers = #tpu.dot_dimension_numbers<[1], [0], [0], [1], [0, 0, 1, 1], [], []>} : vector<2x32xf32>, vector<32x64xf32>, vector<2x64xf32> -> vector<2x64xf32>
    %180 = vector.broadcast %5 : vector<1x64xf32> to vector<2x64xf32>
    %181 = arith.addf %179, %180 : vector<2x64xf32>
    %cst_40 = arith.constant 0.000000e+00 : f32
    %182 = vector.broadcast %cst_40 : f32 to vector<2x16xf32>
    %cst_41 = arith.constant 0.000000e+00 : f32
    %183 = vector.broadcast %cst_41 : f32 to vector<2x16xf32>
    %cst_42 = arith.constant dense<0.000000e+00> : vector<2x64xf32>
    %184 = tpu.matmul %182, %4, %cst_42 {dimension_numbers = #tpu.dot_dimension_numbers<[1], [0], [0], [1], [0, 0, 1, 1], [], []>} : vector<2x16xf32>, vector<16x64xf32>, vector<2x64xf32> -> vector<2x64xf32>
    %185 = arith.addf %181, %184 : vector<2x64xf32>
    %186 = arith.negf %185 : vector<2x64xf32>
    %187 = math.exp %186 : vector<2x64xf32>
    %cst_43 = arith.constant 1.000000e+00 : f32
    %188 = vector.broadcast %cst_43 : f32 to vector<2x64xf32>
    %189 = arith.addf %188, %187 : vector<2x64xf32>
    %190 = arith.divf %188, %189 : vector<2x64xf32>
    %191 = math.tanh %185 : vector<2x64xf32>
    %192 = vector.extract_strided_slice %190 {offsets = [0, 0], sizes = [2, 16], strides = [1, 1]} : vector<2x64xf32> to vector<2x16xf32>
    %193 = vector.extract_strided_slice %190 {offsets = [0, 16], sizes = [2, 16], strides = [1, 1]} : vector<2x64xf32> to vector<2x16xf32>
    %194 = vector.extract_strided_slice %191 {offsets = [0, 32], sizes = [2, 16], strides = [1, 1]} : vector<2x64xf32> to vector<2x16xf32>
    %195 = vector.extract_strided_slice %190 {offsets = [0, 48], sizes = [2, 16], strides = [1, 1]} : vector<2x64xf32> to vector<2x16xf32>
    %196 = arith.mulf %193, %183 : vector<2x16xf32>
    %197 = arith.mulf %192, %194 : vector<2x16xf32>
    %198 = arith.addf %196, %197 : vector<2x16xf32>
    %199 = math.tanh %198 : vector<2x16xf32>
    %200 = arith.mulf %195, %199 : vector<2x16xf32>
    %cst_44 = arith.constant dense<0.000000e+00> : vector<2x16xf32>
    %201 = tpu.matmul %200, %6, %cst_44 {dimension_numbers = #tpu.dot_dimension_numbers<[1], [0], [0], [1], [0, 0, 1, 1], [], []>} : vector<2x16xf32>, vector<16x16xf32>, vector<2x16xf32> -> vector<2x16xf32>
    %202 = vector.broadcast %7 : vector<1x16xf32> to vector<2x16xf32>
    %203 = arith.addf %201, %202 : vector<2x16xf32>
    %cst_45 = arith.constant dense<0.000000e+00> : vector<2x64xf32>
    %204 = tpu.matmul %200, %4, %cst_45 {dimension_numbers = #tpu.dot_dimension_numbers<[1], [0], [0], [1], [0, 0, 1, 1], [], []>} : vector<2x16xf32>, vector<16x64xf32>, vector<2x64xf32> -> vector<2x64xf32>
    %205 = arith.addf %181, %204 : vector<2x64xf32>
    %206 = arith.negf %205 : vector<2x64xf32>
    %207 = math.exp %206 : vector<2x64xf32>
    %cst_46 = arith.constant 1.000000e+00 : f32
    %208 = vector.broadcast %cst_46 : f32 to vector<2x64xf32>
    %209 = arith.addf %208, %207 : vector<2x64xf32>
    %210 = arith.divf %208, %209 : vector<2x64xf32>
    %211 = math.tanh %205 : vector<2x64xf32>
    %212 = vector.extract_strided_slice %210 {offsets = [0, 0], sizes = [2, 16], strides = [1, 1]} : vector<2x64xf32> to vector<2x16xf32>
    %213 = vector.extract_strided_slice %210 {offsets = [0, 16], sizes = [2, 16], strides = [1, 1]} : vector<2x64xf32> to vector<2x16xf32>
    %214 = vector.extract_strided_slice %211 {offsets = [0, 32], sizes = [2, 16], strides = [1, 1]} : vector<2x64xf32> to vector<2x16xf32>
    %215 = vector.extract_strided_slice %210 {offsets = [0, 48], sizes = [2, 16], strides = [1, 1]} : vector<2x64xf32> to vector<2x16xf32>
    %216 = arith.mulf %213, %198 : vector<2x16xf32>
    %217 = arith.mulf %212, %214 : vector<2x16xf32>
    %218 = arith.addf %216, %217 : vector<2x16xf32>
    %219 = math.tanh %218 : vector<2x16xf32>
    %220 = arith.mulf %215, %219 : vector<2x16xf32>
    %cst_47 = arith.constant dense<0.000000e+00> : vector<2x16xf32>
    %221 = tpu.matmul %220, %6, %cst_47 {dimension_numbers = #tpu.dot_dimension_numbers<[1], [0], [0], [1], [0, 0, 1, 1], [], []>} : vector<2x16xf32>, vector<16x16xf32>, vector<2x16xf32> -> vector<2x16xf32>
    %222 = vector.broadcast %7 : vector<1x16xf32> to vector<2x16xf32>
    %223 = arith.addf %221, %222 : vector<2x16xf32>
    %cst_48 = arith.constant dense<0.000000e+00> : vector<2x64xf32>
    %224 = tpu.matmul %220, %4, %cst_48 {dimension_numbers = #tpu.dot_dimension_numbers<[1], [0], [0], [1], [0, 0, 1, 1], [], []>} : vector<2x16xf32>, vector<16x64xf32>, vector<2x64xf32> -> vector<2x64xf32>
    %225 = arith.addf %181, %224 : vector<2x64xf32>
    %226 = arith.negf %225 : vector<2x64xf32>
    %227 = math.exp %226 : vector<2x64xf32>
    %cst_49 = arith.constant 1.000000e+00 : f32
    %228 = vector.broadcast %cst_49 : f32 to vector<2x64xf32>
    %229 = arith.addf %228, %227 : vector<2x64xf32>
    %230 = arith.divf %228, %229 : vector<2x64xf32>
    %231 = math.tanh %225 : vector<2x64xf32>
    %232 = vector.extract_strided_slice %230 {offsets = [0, 0], sizes = [2, 16], strides = [1, 1]} : vector<2x64xf32> to vector<2x16xf32>
    %233 = vector.extract_strided_slice %230 {offsets = [0, 16], sizes = [2, 16], strides = [1, 1]} : vector<2x64xf32> to vector<2x16xf32>
    %234 = vector.extract_strided_slice %231 {offsets = [0, 32], sizes = [2, 16], strides = [1, 1]} : vector<2x64xf32> to vector<2x16xf32>
    %235 = vector.extract_strided_slice %230 {offsets = [0, 48], sizes = [2, 16], strides = [1, 1]} : vector<2x64xf32> to vector<2x16xf32>
    %236 = arith.mulf %233, %218 : vector<2x16xf32>
    %237 = arith.mulf %232, %234 : vector<2x16xf32>
    %238 = arith.addf %236, %237 : vector<2x16xf32>
    %239 = math.tanh %238 : vector<2x16xf32>
    %240 = arith.mulf %235, %239 : vector<2x16xf32>
    %cst_50 = arith.constant dense<0.000000e+00> : vector<2x16xf32>
    %241 = tpu.matmul %240, %6, %cst_50 {dimension_numbers = #tpu.dot_dimension_numbers<[1], [0], [0], [1], [0, 0, 1, 1], [], []>} : vector<2x16xf32>, vector<16x16xf32>, vector<2x16xf32> -> vector<2x16xf32>
    %242 = vector.broadcast %7 : vector<1x16xf32> to vector<2x16xf32>
    %243 = arith.addf %241, %242 : vector<2x16xf32>
    %cst_51 = arith.constant dense<0.000000e+00> : vector<2x64xf32>
    %244 = tpu.matmul %240, %4, %cst_51 {dimension_numbers = #tpu.dot_dimension_numbers<[1], [0], [0], [1], [0, 0, 1, 1], [], []>} : vector<2x16xf32>, vector<16x64xf32>, vector<2x64xf32> -> vector<2x64xf32>
    %245 = arith.addf %181, %244 : vector<2x64xf32>
    %246 = arith.negf %245 : vector<2x64xf32>
    %247 = math.exp %246 : vector<2x64xf32>
    %cst_52 = arith.constant 1.000000e+00 : f32
    %248 = vector.broadcast %cst_52 : f32 to vector<2x64xf32>
    %249 = arith.addf %248, %247 : vector<2x64xf32>
    %250 = arith.divf %248, %249 : vector<2x64xf32>
    %251 = math.tanh %245 : vector<2x64xf32>
    %252 = vector.extract_strided_slice %250 {offsets = [0, 0], sizes = [2, 16], strides = [1, 1]} : vector<2x64xf32> to vector<2x16xf32>
    %253 = vector.extract_strided_slice %250 {offsets = [0, 16], sizes = [2, 16], strides = [1, 1]} : vector<2x64xf32> to vector<2x16xf32>
    %254 = vector.extract_strided_slice %251 {offsets = [0, 32], sizes = [2, 16], strides = [1, 1]} : vector<2x64xf32> to vector<2x16xf32>
    %255 = vector.extract_strided_slice %250 {offsets = [0, 48], sizes = [2, 16], strides = [1, 1]} : vector<2x64xf32> to vector<2x16xf32>
    %256 = arith.mulf %253, %238 : vector<2x16xf32>
    %257 = arith.mulf %252, %254 : vector<2x16xf32>
    %258 = arith.addf %256, %257 : vector<2x16xf32>
    %259 = math.tanh %258 : vector<2x16xf32>
    %260 = arith.mulf %255, %259 : vector<2x16xf32>
    %cst_53 = arith.constant dense<0.000000e+00> : vector<2x16xf32>
    %261 = tpu.matmul %260, %6, %cst_53 {dimension_numbers = #tpu.dot_dimension_numbers<[1], [0], [0], [1], [0, 0, 1, 1], [], []>} : vector<2x16xf32>, vector<16x16xf32>, vector<2x16xf32> -> vector<2x16xf32>
    %262 = vector.broadcast %7 : vector<1x16xf32> to vector<2x16xf32>
    %263 = arith.addf %261, %262 : vector<2x16xf32>
    %cst_54 = arith.constant dense<0.000000e+00> : vector<2x64xf32>
    %264 = tpu.matmul %260, %4, %cst_54 {dimension_numbers = #tpu.dot_dimension_numbers<[1], [0], [0], [1], [0, 0, 1, 1], [], []>} : vector<2x16xf32>, vector<16x64xf32>, vector<2x64xf32> -> vector<2x64xf32>
    %265 = arith.addf %181, %264 : vector<2x64xf32>
    %266 = arith.negf %265 : vector<2x64xf32>
    %267 = math.exp %266 : vector<2x64xf32>
    %cst_55 = arith.constant 1.000000e+00 : f32
    %268 = vector.broadcast %cst_55 : f32 to vector<2x64xf32>
    %269 = arith.addf %268, %267 : vector<2x64xf32>
    %270 = arith.divf %268, %269 : vector<2x64xf32>
    %271 = math.tanh %265 : vector<2x64xf32>
    %272 = vector.extract_strided_slice %270 {offsets = [0, 0], sizes = [2, 16], strides = [1, 1]} : vector<2x64xf32> to vector<2x16xf32>
    %273 = vector.extract_strided_slice %270 {offsets = [0, 16], sizes = [2, 16], strides = [1, 1]} : vector<2x64xf32> to vector<2x16xf32>
    %274 = vector.extract_strided_slice %271 {offsets = [0, 32], sizes = [2, 16], strides = [1, 1]} : vector<2x64xf32> to vector<2x16xf32>
    %275 = vector.extract_strided_slice %270 {offsets = [0, 48], sizes = [2, 16], strides = [1, 1]} : vector<2x64xf32> to vector<2x16xf32>
    %276 = arith.mulf %273, %258 : vector<2x16xf32>
    %277 = arith.mulf %272, %274 : vector<2x16xf32>
    %278 = arith.addf %276, %277 : vector<2x16xf32>
    %279 = math.tanh %278 : vector<2x16xf32>
    %280 = arith.mulf %275, %279 : vector<2x16xf32>
    %cst_56 = arith.constant dense<0.000000e+00> : vector<2x16xf32>
    %281 = tpu.matmul %280, %6, %cst_56 {dimension_numbers = #tpu.dot_dimension_numbers<[1], [0], [0], [1], [0, 0, 1, 1], [], []>} : vector<2x16xf32>, vector<16x16xf32>, vector<2x16xf32> -> vector<2x16xf32>
    %282 = vector.broadcast %7 : vector<1x16xf32> to vector<2x16xf32>
    %283 = arith.addf %281, %282 : vector<2x16xf32>
    %cst_57 = arith.constant dense<0.000000e+00> : vector<2x64xf32>
    %284 = tpu.matmul %280, %4, %cst_57 {dimension_numbers = #tpu.dot_dimension_numbers<[1], [0], [0], [1], [0, 0, 1, 1], [], []>} : vector<2x16xf32>, vector<16x64xf32>, vector<2x64xf32> -> vector<2x64xf32>
    %285 = arith.addf %181, %284 : vector<2x64xf32>
    %286 = arith.negf %285 : vector<2x64xf32>
    %287 = math.exp %286 : vector<2x64xf32>
    %cst_58 = arith.constant 1.000000e+00 : f32
    %288 = vector.broadcast %cst_58 : f32 to vector<2x64xf32>
    %289 = arith.addf %288, %287 : vector<2x64xf32>
    %290 = arith.divf %288, %289 : vector<2x64xf32>
    %291 = math.tanh %285 : vector<2x64xf32>
    %292 = vector.extract_strided_slice %290 {offsets = [0, 0], sizes = [2, 16], strides = [1, 1]} : vector<2x64xf32> to vector<2x16xf32>
    %293 = vector.extract_strided_slice %290 {offsets = [0, 16], sizes = [2, 16], strides = [1, 1]} : vector<2x64xf32> to vector<2x16xf32>
    %294 = vector.extract_strided_slice %291 {offsets = [0, 32], sizes = [2, 16], strides = [1, 1]} : vector<2x64xf32> to vector<2x16xf32>
    %295 = vector.extract_strided_slice %290 {offsets = [0, 48], sizes = [2, 16], strides = [1, 1]} : vector<2x64xf32> to vector<2x16xf32>
    %296 = arith.mulf %293, %278 : vector<2x16xf32>
    %297 = arith.mulf %292, %294 : vector<2x16xf32>
    %298 = arith.addf %296, %297 : vector<2x16xf32>
    %299 = math.tanh %298 : vector<2x16xf32>
    %300 = arith.mulf %295, %299 : vector<2x16xf32>
    %cst_59 = arith.constant dense<0.000000e+00> : vector<2x16xf32>
    %301 = tpu.matmul %300, %6, %cst_59 {dimension_numbers = #tpu.dot_dimension_numbers<[1], [0], [0], [1], [0, 0, 1, 1], [], []>} : vector<2x16xf32>, vector<16x16xf32>, vector<2x16xf32> -> vector<2x16xf32>
    %302 = vector.broadcast %7 : vector<1x16xf32> to vector<2x16xf32>
    %303 = arith.addf %301, %302 : vector<2x16xf32>
    %cst_60 = arith.constant dense<0.000000e+00> : vector<2x64xf32>
    %304 = tpu.matmul %300, %4, %cst_60 {dimension_numbers = #tpu.dot_dimension_numbers<[1], [0], [0], [1], [0, 0, 1, 1], [], []>} : vector<2x16xf32>, vector<16x64xf32>, vector<2x64xf32> -> vector<2x64xf32>
    %305 = arith.addf %181, %304 : vector<2x64xf32>
    %306 = arith.negf %305 : vector<2x64xf32>
    %307 = math.exp %306 : vector<2x64xf32>
    %cst_61 = arith.constant 1.000000e+00 : f32
    %308 = vector.broadcast %cst_61 : f32 to vector<2x64xf32>
    %309 = arith.addf %308, %307 : vector<2x64xf32>
    %310 = arith.divf %308, %309 : vector<2x64xf32>
    %311 = math.tanh %305 : vector<2x64xf32>
    %312 = vector.extract_strided_slice %310 {offsets = [0, 0], sizes = [2, 16], strides = [1, 1]} : vector<2x64xf32> to vector<2x16xf32>
    %313 = vector.extract_strided_slice %310 {offsets = [0, 16], sizes = [2, 16], strides = [1, 1]} : vector<2x64xf32> to vector<2x16xf32>
    %314 = vector.extract_strided_slice %311 {offsets = [0, 32], sizes = [2, 16], strides = [1, 1]} : vector<2x64xf32> to vector<2x16xf32>
    %315 = vector.extract_strided_slice %310 {offsets = [0, 48], sizes = [2, 16], strides = [1, 1]} : vector<2x64xf32> to vector<2x16xf32>
    %316 = arith.mulf %313, %298 : vector<2x16xf32>
    %317 = arith.mulf %312, %314 : vector<2x16xf32>
    %318 = arith.addf %316, %317 : vector<2x16xf32>
    %319 = math.tanh %318 : vector<2x16xf32>
    %320 = arith.mulf %315, %319 : vector<2x16xf32>
    %cst_62 = arith.constant dense<0.000000e+00> : vector<2x16xf32>
    %321 = tpu.matmul %320, %6, %cst_62 {dimension_numbers = #tpu.dot_dimension_numbers<[1], [0], [0], [1], [0, 0, 1, 1], [], []>} : vector<2x16xf32>, vector<16x16xf32>, vector<2x16xf32> -> vector<2x16xf32>
    %322 = vector.broadcast %7 : vector<1x16xf32> to vector<2x16xf32>
    %323 = arith.addf %321, %322 : vector<2x16xf32>
    %cst_63 = arith.constant dense<0.000000e+00> : vector<2x64xf32>
    %324 = tpu.matmul %320, %4, %cst_63 {dimension_numbers = #tpu.dot_dimension_numbers<[1], [0], [0], [1], [0, 0, 1, 1], [], []>} : vector<2x16xf32>, vector<16x64xf32>, vector<2x64xf32> -> vector<2x64xf32>
    %325 = arith.addf %181, %324 : vector<2x64xf32>
    %326 = arith.negf %325 : vector<2x64xf32>
    %327 = math.exp %326 : vector<2x64xf32>
    %cst_64 = arith.constant 1.000000e+00 : f32
    %328 = vector.broadcast %cst_64 : f32 to vector<2x64xf32>
    %329 = arith.addf %328, %327 : vector<2x64xf32>
    %330 = arith.divf %328, %329 : vector<2x64xf32>
    %331 = math.tanh %325 : vector<2x64xf32>
    %332 = vector.extract_strided_slice %330 {offsets = [0, 0], sizes = [2, 16], strides = [1, 1]} : vector<2x64xf32> to vector<2x16xf32>
    %333 = vector.extract_strided_slice %330 {offsets = [0, 16], sizes = [2, 16], strides = [1, 1]} : vector<2x64xf32> to vector<2x16xf32>
    %334 = vector.extract_strided_slice %331 {offsets = [0, 32], sizes = [2, 16], strides = [1, 1]} : vector<2x64xf32> to vector<2x16xf32>
    %335 = vector.extract_strided_slice %330 {offsets = [0, 48], sizes = [2, 16], strides = [1, 1]} : vector<2x64xf32> to vector<2x16xf32>
    %336 = arith.mulf %333, %318 : vector<2x16xf32>
    %337 = arith.mulf %332, %334 : vector<2x16xf32>
    %338 = arith.addf %336, %337 : vector<2x16xf32>
    %339 = math.tanh %338 : vector<2x16xf32>
    %340 = arith.mulf %335, %339 : vector<2x16xf32>
    %cst_65 = arith.constant dense<0.000000e+00> : vector<2x16xf32>
    %341 = tpu.matmul %340, %6, %cst_65 {dimension_numbers = #tpu.dot_dimension_numbers<[1], [0], [0], [1], [0, 0, 1, 1], [], []>} : vector<2x16xf32>, vector<16x16xf32>, vector<2x16xf32> -> vector<2x16xf32>
    %342 = vector.broadcast %7 : vector<1x16xf32> to vector<2x16xf32>
    %343 = arith.addf %341, %342 : vector<2x16xf32>
    %344 = tpu.concatenate %203, %223, %243, %263, %283, %303, %323, %343 in 1 : vector<2x16xf32>, vector<2x16xf32>, vector<2x16xf32>, vector<2x16xf32>, vector<2x16xf32>, vector<2x16xf32>, vector<2x16xf32>, vector<2x16xf32> -> vector<2x128xf32>
    %c0_66 = arith.constant 0 : index
    %c0_67 = arith.constant 0 : index
    %345 = vector.load %arg4[%c0_66, %c0_67] : memref<2x128xf32, #tpu.memory_space<vmem>>, vector<2x128xf32>
    tpu.vector_store %arg4[%c0_66, %c0_67], %344 {strides = array<i32>} : memref<2x128xf32, #tpu.memory_space<vmem>>, vector<2x128xf32>,
    return
  }
}

</mosaic_0001>

<bundles_post_ra>
// kernel: lstm_autoencoder.1
= control target key start
LH: loop header
LB: loop body
LE: loop exit
PB: predicated region body
PF: predicated region fallthrough
CT: control target
= control target key end

     0   :  { %9 = vsyncpa [#allocation3], 0  ;;  %s3684_s15 = smov [#allocation2]   ;;  %s4086_s0 = inlined_call_operand.vmem [shape: f32[2,128], index: 0, kind: input, shape index: {}]   ;;  %s4087_s1 = inlined_call_operand.vmem [shape: f32[49,128], index: 1, kind: input, shape index: {}]   ;;  %s4088_s2 = inlined_call_operand.hbm [shape: f32[49,64], index: 2, kind: input, shape index: {}]   ;;  %s4089_s3 = inlined_call_operand.vmem [shape: f32[17,16], index: 3, kind: input, shape index: {}]   ;;  %s4090_s4 = inlined_call_operand.vmem [shape: f32[2,128], index: 4, kind: output, shape index: {}]  }
   0x1   :  { %s19_s16 = sshll.u32 %s3684_s15, 4  ;;  %s3660_s19 = scalar_lea.hbm %s4088_s2, 896  ;;  %s20_s16 = int_to_ptr.vmem [resolvable:$true] %s19_s16 }
   0x2   :  { %p3661_p0 = scmp.ne.s32.totalorder %s4088_s2, %s3660_s19  ;;  %p3664_p1 = scmp.lt.u32.totalorder %s3660_s19, %s4088_s2 }
   0x4   :  { %p3666_p2 = pnand %p3664_p1, %p3661_p0 }
   0x6   :  { %3669 = shalt.err (!%p3666_p2)
}
   0x7   :  { %s3670_s24 = scalar_lea.vmem %s20_s16, 896  ;;  %p3675_p4 = scmp.lt.s32.totalorder %s20_s16, %s20_s16 }
   0x8   :  { %p3671_p3 = scmp.ne.s32.totalorder %s20_s16, %s3670_s24  ;;  %p3676_p5 = scmp.lt.s32.totalorder %s3670_s24, %s3670_s24 }
   0xa   :  { %p3677_p6 = por %p3676_p5, %p3675_p4 }
   0xc   :  { %p3678_p7 = pnand %p3677_p6, %p3671_p3 }
   0xe   :  { %3681 = shalt.err (!%p3678_p7)
}
   0xf   :  { %s3685_s25 = smov 128   ;;  %s3686_s26 = smov 8  }
  0x10   :  { %25 = dma.hbm_to_vmem [thread:$0]  %s4088_s2, 896, %s20_s16, [#allocation3], %s3685_s25, %s3685_s25, %s3686_s26  }
  0x11   :  { %3682 = dma.done.wait [#allocation3], 896  }
  0x12   :  { %3683 = vsyncadd [#allocation3], 4294966400  ;;  %v3687_v0 = vmov 0.0|0.0   ;;  %vm3688_vm0 = vmmov 0   ;;  %v3689_v1 = vmov 0.0   ;;  %v31_v3 = vld [vmem:[%s4087_s1] sm:$0xff] }
  0x13   :  { %3369 = vmatprep.subr.bf16.mxu0 %v3687_v0  ;;  %3372 = vmatprep.subr.bf16.mxu1 %v3687_v0  ;;  %v3743_v2 = vld [vmem:[%s4086_s0] sm:$0x3]  ;;  %v32_v4 = vld [vmem:[%s4087_s1 + $0x8] sm:$0xff]  ;;  %s3690_s8 = smov 96   ;;  %s3691_s9 = smov 32   ;;  %vm53_vm1 = vcmask 130048  }
  0x14   :  { %3106 = vmatprep.mubr.msk.f32.mxu0 %vm3688_vm0, %v3689_v1  ;;  %3113 = vmatprep.mubr.msk.f32.mxu1 %vm3688_vm0, %v3689_v1  ;;  %v3755_v5 = vpack.c.bf16 %v32_v4, %v31_v3  ;;  %s3692_s0 = smov 64   ;;  %v33_v7 = vld [vmem:[%s4087_s1 + $0x10] sm:$0xff]  ;;  %v34_v8 = vld [vmem:[%s4087_s1 + $0x18] sm:$0xff]  ;;  %v35_v12 = vld [vmem:[%s4087_s1 + $0x20] sm:$0xff]  ;;  %s3694_s20 = smov 48   ;;  %vm645_vm2 = vcmask 261120  }
  0x15   :  { %201 = vrot.lane.b32.xlu0 %v3743_v2, %s3690_s8  ;;  %497 = vrot.lane.b32.xlu1 %v3743_v2, %s3691_s9  ;;  %v3784_v11 = vpack.c.bf16 %v34_v8, %v33_v7  ;;  %v36_v13 = vld [vmem:[%s4087_s1 + $0x28] sm:$0xff]  ;;  %v3812_v15 = vld [vmem:[%s4087_s1 + $0x30] ss:$0 sm:$0xff]  ;;  %s3693_s1 = smov 112   ;;  %s3695_s21 = smov 80   ;;  %vm2919_vm3 = vcmask 392192  }
  0x16   :  { %3371 = vmatpush3.bf16.msra.mxu0 %v3755_v5  ;;  %3374 = vmatpush3.bf16.msra.mxu1 %v3755_v5  ;;  %v3795_v14 = vpack.c.bf16 %v36_v13, %v35_v12  ;;  %s3696_s22 = smov 16   ;;  %vm2921_vm4 = vcmask 523264   ;;  %vm2923_vm5 = vcmask 654336   ;;  %vm2925_vm6 = vcmask 785408  }
  0x17   :  { %3375 = vmatprep.subr.bf16.mxu0 %v3687_v0  ;;  %3378 = vmatprep.subr.bf16.mxu1 %v3687_v0  ;;  %vm2927_vm7 = vcmask 916480  }
  0x19   :  { %349 = vrot.lane.b32.xlu0 %v3743_v2, %s3692_s0  ;;  %3107 = vmatmul.mubr.msk.f32.vlgmr.msra.gmra.mrb[0].mxu0 %vm53_vm1, %v3743_v2 }
  0x1a   :  { %3377 = vmatpush3.bf16.msra.mxu0 %v3755_v5  ;;  %3120 = vmatprep.mubr.msk.f32.mxu0 %vm3688_vm0, %v3689_v1 }
  0x1b   :  { %3381 = vmatprep.subr.bf16.mxu0 %v3687_v0 }
  0x87   :  { %v202_v6 = vpop.permute.xlu0 %201  ;;  %v498_v10 = vpop.permute.xlu1 %497 }
  0x88   :  { %3121 = vmatmul.mubr.msk.f32.vlgmr.msra.gmra.mrb[2].mxu0 %vm53_vm1, %v202_v6 }
  0x89   :  { %3383 = vmatpush3.bf16.msra.mxu0 %v3755_v5  ;;  %3134 = vmatprep.mubr.msk.f32.mxu0 %vm3688_vm0, %v3689_v1 }
  0x8a   :  { %3387 = vmatprep.subr.bf16.mxu0 %v3687_v0 }
  0x8b   :  { %v350_v9 = vpop.permute.xlu0 %349 }
  0x8c   :  { %3135 = vmatmul.mubr.msk.f32.vlgmr.msra.gmra.mrb[4].mxu0 %vm53_vm1, %v350_v9 }
  0x8d   :  { %3389 = vmatpush3.bf16.msra.mxu0 %v3755_v5  ;;  %3148 = vmatprep.mubr.msk.f32.mxu0 %vm3688_vm0, %v3689_v1 }
  0x8e   :  { %3393 = vmatprep.subr.bf16.mxu0 %v3687_v0 }
  0x90   :  { %3149 = vmatmul.mubr.msk.f32.vlgmr.msra.gmra.mrb[6].mxu0 %vm53_vm1, %v498_v10 }
  0x91   :  { %3395 = vmatpush3.bf16.msra.mxu0 %v3784_v11  ;;  %3166 = vmatprep.mubr.msk.f32.mxu0 %vm3688_vm0, %v3689_v1 }
  0x92   :  { %3396 = vmatprep.subr.bf16.mxu0 %v3687_v0 }
  0x95   :  { %3398 = vmatpush3.bf16.msra.mxu0 %v3795_v14 }
  0x96   :  { %3405 = vmatprep.subr.bf16.mxu0 %v3687_v0 }
  0x98   :  { %3167 = vmatmul.mubr.f32.vlgmr.msra.gmra.mrb[0].mxu0 %v3689_v1 }
  0x99   :  { %3407 = vmatpush3.bf16.msra.mxu0 %v3784_v11  ;;  %3188 = vmatprep.mubr.msk.f32.mxu0 %vm3688_vm0, %v3689_v1 }
  0x9a   :  { %3408 = vmatprep.subr.bf16.mxu0 %v3687_v0 }
  0x9d   :  { %3410 = vmatpush3.bf16.msra.mxu0 %v3795_v14 }
  0x9e   :  { %3417 = vmatprep.subr.bf16.mxu0 %v3687_v0 }
 0x16b   :  { %v715_v16 = vpop.f32.mrb[0].mxu0 }
 0x16c   :  { %v3495_v17 = vadd.f32 %v3812_v15, %v715_v16  ;;  %v3168_v18 = vpop.f32.mrb[1].mxu0 }
 0x16e   :  { %3532 = vtanh.f32 %v3495_v17  ;;  %v2944_v20 = vmul.f32 -1.442695, %v3495_v17 }
 0x170   :  { %3534 = vpow2.f32 %v2944_v20 }
 0x178   :  { %v3533_v19 = vpop.eup %3532 }
 0x179   :  { %729 = vrot.lane.b32.xlu1 %v3533_v19, %s3692_s0 }
 0x17a   :  { %v3535_v21 = vpop.eup %3534 }
 0x17b   :  { %v723_v22 = vadd.f32 1.0, %v3535_v21 }
 0x17d   :  { %3536 = vrcp.f32 %v723_v22 }
 0x187   :  { %v3537_v23 = vpop.eup %3536 }
 0x188   :  { %v727_v26 = vmul.f32 0.0, %v3537_v23 }
 0x1eb   :  { %v730_v24 = vpop.permute.xlu1 %729 }
 0x1ec   :  { %v732_v25 = vmul.f32 %v3537_v23, %v730_v24 }
 0x1ee   :  { %734 = vrot.lane.b32.xlu0 %v732_v25, %s3691_s9 }
 0x1f2   :  { %127 = vrot.lane.b32.xlu0 %v3743_v2, %s3693_s1 }
 0x1f6   :  { %423 = vrot.lane.b32.xlu0 %v3743_v2, %s3694_s20 }
 0x260   :  { %v735_v27 = vpop.permute.xlu0 %734 }
 0x261   :  { %v737_v28 = vadd.f32 %v735_v27, %v727_v26 }
 0x263   :  { %3538 = vtanh.f32 %v737_v28 }
 0x264   :  { %v128_v29 = vpop.permute.xlu0 %127 }
 0x265   :  { %3114 = vmatmul.mubr.msk.f32.vlgmr.msra.gmra.mrb[0].mxu1 %vm53_vm1, %v128_v29 }
 0x266   :  { %3380 = vmatpush3.bf16.msra.mxu1 %v3755_v5  ;;  %3127 = vmatprep.mubr.msk.f32.mxu1 %vm3688_vm0, %v3689_v1 }
 0x267   :  { %3384 = vmatprep.subr.bf16.mxu1 %v3687_v0 }
 0x268   :  { %v424_v34 = vpop.permute.xlu0 %423 }
 0x26d   :  { %v3539_v30 = vpop.eup %3538 }
 0x26e   :  { %740 = vrot.lane.b32.xlu1 %v3539_v30, %s3692_s0 }
 0x272   :  { %275 = vrot.lane.b32.xlu1 %v3743_v2, %s3695_s21 }
 0x276   :  { %571 = vrot.lane.b32.xlu1 %v3743_v2, %s3696_s22 }
 0x2e0   :  { %v741_v31 = vpop.permute.xlu1 %740 }
 0x2e1   :  { %v743_v32 = vmul.f32 %v3537_v23, %v741_v31 }
 0x2e3   :  { %745 = vrot.lane.b32.xlu0 %v743_v32, %s3691_s9 }
 0x2e4   :  { %v276_v33 = vpop.permute.xlu1 %275 }
 0x2e5   :  { %3128 = vmatmul.mubr.msk.f32.vlgmr.msra.gmra.mrb[2].mxu1 %vm53_vm1, %v276_v33 }
 0x2e6   :  { %3386 = vmatpush3.bf16.msra.mxu1 %v3755_v5  ;;  %3141 = vmatprep.mubr.msk.f32.mxu1 %vm3688_vm0, %v3689_v1 }
 0x2e7   :  { %3390 = vmatprep.subr.bf16.mxu1 %v3687_v0 }
 0x2e8   :  { %v572_v35 = vpop.permute.xlu1 %571 }
 0x2e9   :  { %3142 = vmatmul.mubr.msk.f32.vlgmr.msra.gmra.mrb[4].mxu1 %vm53_vm1, %v424_v34 }
 0x2ea   :  { %3392 = vmatpush3.bf16.msra.mxu1 %v3755_v5  ;;  %3155 = vmatprep.mubr.msk.f32.mxu1 %vm3688_vm0, %v3689_v1 }
 0x2eb   :  { %3399 = vmatprep.subr.bf16.mxu1 %v3687_v0 }
 0x2ed   :  { %3156 = vmatmul.mubr.msk.f32.vlgmr.msra.gmra.mrb[6].mxu1 %vm53_vm1, %v572_v35 }
 0x2ee   :  { %3401 = vmatpush3.bf16.msra.mxu1 %v3784_v11  ;;  %3177 = vmatprep.mubr.msk.f32.mxu1 %vm3688_vm0, %v3689_v1 }
 0x2ef   :  { %3402 = vmatprep.subr.bf16.mxu1 %v3687_v0 }
 0x2f2   :  { %3404 = vmatpush3.bf16.msra.mxu1 %v3795_v14 }
 0x2f3   :  { %3411 = vmatprep.subr.bf16.mxu1 %v3687_v0 }
 0x355   :  { %v746_v36 = vpop.permute.xlu0 %745 }
 0x356   :  { %3178 = vmatmul.mubr.msk.f32.vlgmr.msra.gmra.mrb[0].mxu1 %vm645_vm2, %v746_v36 }
 0x357   :  { %3413 = vmatpush3.bf16.msra.mxu1 %v3784_v11  ;;  %3199 = vmatprep.mubr.msk.f32.mxu1 %vm3688_vm0, %v3689_v1 }
 0x358   :  { %3414 = vmatprep.subr.bf16.mxu1 %v3687_v0 }
 0x35b   :  { %3416 = vmatpush3.bf16.msra.mxu1 %v3795_v14 }
 0x35c   :  { %3423 = vmatprep.subr.bf16.mxu1 %v3687_v0 }
 0x429   :  { %v815_v37 = vpop.f32.mrb[0].mxu1 }
 0x42a   :  { %v3496_v38 = vadd.f32 %v3812_v15, %v815_v37  ;;  %v3179_v39 = vpop.f32.mrb[1].mxu1 }
 0x42c   :  { %3540 = vtanh.f32 %v3496_v38  ;;  %v2946_v41 = vmul.f32 -1.442695, %v3496_v38 }
 0x42e   :  { %3542 = vpow2.f32 %v2946_v41 }
 0x436   :  { %v3541_v40 = vpop.eup %3540 }
 0x437   :  { %829 = vrot.lane.b32.xlu1 %v3541_v40, %s3692_s0 }
 0x438   :  { %v3543_v42 = vpop.eup %3542 }
 0x439   :  { %v823_v43 = vadd.f32 1.0, %v3543_v42 }
 0x43b   :  { %3544 = vrcp.f32 %v823_v43 }
 0x445   :  { %v3545_v44 = vpop.eup %3544 }
 0x446   :  { %v827_v47 = vmul.f32 %v3545_v44, %v737_v28 }
 0x4a9   :  { %v830_v45 = vpop.permute.xlu1 %829 }
 0x4aa   :  { %v832_v46 = vmul.f32 %v3545_v44, %v830_v45 }
 0x4ac   :  { %834 = vrot.lane.b32.xlu0 %v832_v46, %s3691_s9 }
 0x51e   :  { %v835_v48 = vpop.permute.xlu0 %834 }
 0x51f   :  { %v837_v49 = vadd.f32 %v835_v48, %v827_v47 }
 0x521   :  { %3546 = vtanh.f32 %v837_v49 }
 0x52b   :  { %v3547_v50 = vpop.eup %3546 }
 0x52c   :  { %840 = vrot.lane.b32.xlu1 %v3547_v50, %s3692_s0 }
 0x59e   :  { %v841_v51 = vpop.permute.xlu1 %840 }
 0x59f   :  { %v843_v52 = vmul.f32 %v3545_v44, %v841_v51 }
 0x5a1   :  { %845 = vrot.lane.b32.xlu0 %v843_v52, %s3691_s9 }
 0x613   :  { %v846_v53 = vpop.permute.xlu0 %845 }
 0x614   :  { %3189 = vmatmul.mubr.msk.f32.vlgmr.msra.gmra.mrb[2].mxu0 %vm645_vm2, %v846_v53 }
 0x615   :  { %3419 = vmatpush3.bf16.msra.mxu0 %v3784_v11  ;;  %3210 = vmatprep.mubr.msk.f32.mxu0 %vm3688_vm0, %v3689_v1 }
 0x616   :  { %3420 = vmatprep.subr.bf16.mxu0 %v3687_v0 }
 0x619   :  { %3422 = vmatpush3.bf16.msra.mxu0 %v3795_v14 }
 0x61a   :  { %3429 = vmatprep.subr.bf16.mxu0 %v3687_v0 }
 0x6e7   :  { %v915_v54 = vpop.f32.mrb[2].mxu0 }
 0x6e8   :  { %v3497_v55 = vadd.f32 %v3812_v15, %v915_v54  ;;  %v3190_v56 = vpop.f32.mrb[3].mxu0 }
 0x6ea   :  { %3548 = vtanh.f32 %v3497_v55  ;;  %v2948_v58 = vmul.f32 -1.442695, %v3497_v55 }
 0x6ec   :  { %3550 = vpow2.f32 %v2948_v58 }
 0x6f4   :  { %v3549_v57 = vpop.eup %3548 }
 0x6f5   :  { %929 = vrot.lane.b32.xlu1 %v3549_v57, %s3692_s0 }
 0x6f6   :  { %v3551_v59 = vpop.eup %3550 }
 0x6f7   :  { %v923_v60 = vadd.f32 1.0, %v3551_v59 }
 0x6f9   :  { %3552 = vrcp.f32 %v923_v60 }
 0x703   :  { %v3553_v61 = vpop.eup %3552 }
 0x704   :  { %v927_v2 = vmul.f32 %v3553_v61, %v837_v49 }
 0x767   :  { %v930_v62 = vpop.permute.xlu1 %929 }
 0x768   :  { %v932_v63 = vmul.f32 %v3553_v61, %v930_v62 }
 0x76a   :  { %934 = vrot.lane.b32.xlu0 %v932_v63, %s3691_s9 }
 0x7dc   :  { %v935_v3 = vpop.permute.xlu0 %934 }
 0x7dd   :  { %v937_v4 = vadd.f32 %v935_v3, %v927_v2 }
 0x7df   :  { %3554 = vtanh.f32 %v937_v4 }
 0x7e9   :  { %v3555_v5 = vpop.eup %3554 }
 0x7ea   :  { %940 = vrot.lane.b32.xlu1 %v3555_v5, %s3692_s0 }
 0x85c   :  { %v941_v6 = vpop.permute.xlu1 %940 }
 0x85d   :  { %v943_v7 = vmul.f32 %v3553_v61, %v941_v6 }
 0x85f   :  { %945 = vrot.lane.b32.xlu0 %v943_v7, %s3691_s9 }
 0x8d1   :  { %v946_v8 = vpop.permute.xlu0 %945 }
 0x8d2   :  { %3200 = vmatmul.mubr.msk.f32.vlgmr.msra.gmra.mrb[2].mxu1 %vm645_vm2, %v946_v8 }
 0x8d3   :  { %3425 = vmatpush3.bf16.msra.mxu1 %v3784_v11  ;;  %3221 = vmatprep.mubr.msk.f32.mxu1 %vm3688_vm0, %v3689_v1 }
 0x8d4   :  { %3426 = vmatprep.subr.bf16.mxu1 %v3687_v0 }
 0x8d7   :  { %3428 = vmatpush3.bf16.msra.mxu1 %v3795_v14 }
 0x8d8   :  { %3435 = vmatprep.subr.bf16.mxu1 %v3687_v0 }
 0x9a5   :  { %v1015_v9 = vpop.f32.mrb[2].mxu1 }
 0x9a6   :  { %v3498_v10 = vadd.f32 %v3812_v15, %v1015_v9  ;;  %v3201_v12 = vpop.f32.mrb[3].mxu1 }
 0x9a8   :  { %3556 = vtanh.f32 %v3498_v10  ;;  %v2950_v16 = vmul.f32 -1.442695, %v3498_v10 }
 0x9aa   :  { %3558 = vpow2.f32 %v2950_v16 }
 0x9b2   :  { %v3557_v13 = vpop.eup %3556 }
 0x9b3   :  { %1029 = vrot.lane.b32.xlu1 %v3557_v13, %s3692_s0 }
 0x9b4   :  { %v3559_v17 = vpop.eup %3558 }
 0x9b5   :  { %v1023_v18 = vadd.f32 1.0, %v3559_v17 }
 0x9b7   :  { %3560 = vrcp.f32 %v1023_v18 }
 0x9c1   :  { %v3561_v19 = vpop.eup %3560 }
 0x9c2   :  { %v1027_v22 = vmul.f32 %v3561_v19, %v937_v4 }
 0xa25   :  { %v1030_v20 = vpop.permute.xlu1 %1029 }
 0xa26   :  { %v1032_v21 = vmul.f32 %v3561_v19, %v1030_v20 }
 0xa28   :  { %1034 = vrot.lane.b32.xlu0 %v1032_v21, %s3691_s9 }
 0xa9a   :  { %v1035_v23 = vpop.permute.xlu0 %1034 }
 0xa9b   :  { %v1037_v24 = vadd.f32 %v1035_v23, %v1027_v22 }
 0xa9d   :  { %3562 = vtanh.f32 %v1037_v24 }
 0xaa7   :  { %v3563_v25 = vpop.eup %3562 }
 0xaa8   :  { %1040 = vrot.lane.b32.xlu1 %v3563_v25, %s3692_s0 }
 0xb1a   :  { %v1041_v26 = vpop.permute.xlu1 %1040 }
 0xb1b   :  { %v1043_v27 = vmul.f32 %v3561_v19, %v1041_v26 }
 0xb1d   :  { %1045 = vrot.lane.b32.xlu0 %v1043_v27, %s3691_s9 }
 0xb8f   :  { %v1046_v28 = vpop.permute.xlu0 %1045 }
 0xb90   :  { %3211 = vmatmul.mubr.msk.f32.vlgmr.msra.gmra.mrb[4].mxu0 %vm645_vm2, %v1046_v28 }
 0xb91   :  { %3431 = vmatpush3.bf16.msra.mxu0 %v3784_v11  ;;  %3232 = vmatprep.mubr.msk.f32.mxu0 %vm3688_vm0, %v3689_v1 }
 0xb92   :  { %3432 = vmatprep.subr.bf16.mxu0 %v3687_v0 }
 0xb95   :  { %3434 = vmatpush3.bf16.msra.mxu0 %v3795_v14 }
 0xb96   :  { %3441 = vmatprep.subr.bf16.mxu0 %v3687_v0 }
 0xc63   :  { %v1115_v29 = vpop.f32.mrb[4].mxu0 }
 0xc64   :  { %v3499_v30 = vadd.f32 %v3812_v15, %v1115_v29  ;;  %v3212_v31 = vpop.f32.mrb[5].mxu0 }
 0xc66   :  { %3564 = vtanh.f32 %v3499_v30  ;;  %v2952_v33 = vmul.f32 -1.442695, %v3499_v30 }
 0xc68   :  { %3566 = vpow2.f32 %v2952_v33  ;;  %v40_v33 = vld [vmem:[#allocation2 + $0x10] sm:$0xff] }
 0xc70   :  { %v3565_v32 = vpop.eup %3564 }
 0xc71   :  { %1129 = vrot.lane.b32.xlu1 %v3565_v32, %s3692_s0  ;;  %v39_v32 = vld [vmem:[#allocation2 + $0x8] sm:$0xff] }
 0xc72   :  { %v3567_v34 = vpop.eup %3566 }
 0xc73   :  { %v1123_v35 = vadd.f32 1.0, %v3567_v34 }
 0xc75   :  { %3568 = vrcp.f32 %v1123_v35  ;;  %v41_v35 = vld [vmem:[#allocation2 + $0x18] sm:$0xff] }
 0xc7f   :  { %v3569_v36 = vpop.eup %3568 }
 0xc80   :  { %v1127_v39 = vmul.f32 %v3569_v36, %v1037_v24 }
 0xce3   :  { %v1130_v37 = vpop.permute.xlu1 %1129 }
 0xce4   :  { %v1132_v38 = vmul.f32 %v3569_v36, %v1130_v37  ;;  %v43_v37 = vld [vmem:[#allocation2 + $0x28] sm:$0xff] }
 0xce6   :  { %1134 = vrot.lane.b32.xlu0 %v1132_v38, %s3691_s9 }
 0xd58   :  { %v1135_v40 = vpop.permute.xlu0 %1134 }
 0xd59   :  { %v1137_v41 = vadd.f32 %v1135_v40, %v1127_v39  ;;  %v3445_v39 = vpack.c.bf16 %v41_v35, %v40_v33 }
 0xd5b   :  { %3570 = vtanh.f32 %v1137_v41 }
 0xd65   :  { %v3571_v42 = vpop.eup %3570 }
 0xd66   :  { %1140 = vrot.lane.b32.xlu1 %v3571_v42, %s3692_s0 }
 0xdd8   :  { %v1141_v43 = vpop.permute.xlu1 %1140 }
 0xdd9   :  { %v1143_v44 = vmul.f32 %v3569_v36, %v1141_v43  ;;  %v42_v36 = vld [vmem:[#allocation2 + $0x20] sm:$0xff] }
 0xdda   :  { %v3923_v38 = vpack.c.bf16 %v43_v37, %v42_v36 }
 0xddb   :  { %1145 = vrot.lane.b32.xlu0 %v1143_v44, %s3691_s9 }
 0xe4d   :  { %v1146_v45 = vpop.permute.xlu0 %1145 }
 0xe4e   :  { %3222 = vmatmul.mubr.msk.f32.vlgmr.msra.gmra.mrb[4].mxu1 %vm645_vm2, %v1146_v45 }
 0xe4f   :  { %3437 = vmatpush3.bf16.msra.mxu1 %v3784_v11  ;;  %3243 = vmatprep.mubr.msk.f32.mxu1 %vm3688_vm0, %v3689_v1 }
 0xe50   :  { %3438 = vmatprep.subr.bf16.mxu1 %v3687_v0 }
 0xe53   :  { %3440 = vmatpush3.bf16.msra.mxu1 %v3795_v14 }
 0xe54   :  { %3447 = vmatprep.subr.bf16.mxu1 %v3687_v0 }
 0xf21   :  { %v1215_v46 = vpop.f32.mrb[4].mxu1 }
 0xf22   :  { %v3500_v47 = vadd.f32 %v3812_v15, %v1215_v46  ;;  %v3223_v48 = vpop.f32.mrb[5].mxu1  ;;  %v2959_v46 = vld [vmem:[#allocation2 + $0x30] ss:$0 sm:$0xff] }
 0xf24   :  { %3572 = vtanh.f32 %v3500_v47  ;;  %v2954_v50 = vmul.f32 -1.442695, %v3500_v47 }
 0xf26   :  { %3574 = vpow2.f32 %v2954_v50 }
 0xf2e   :  { %v3573_v49 = vpop.eup %3572 }
 0xf2f   :  { %1229 = vrot.lane.b32.xlu1 %v3573_v49, %s3692_s0 }
 0xf30   :  { %v3575_v11 = vpop.eup %3574 }
 0xf31   :  { %v1223_v51 = vadd.f32 1.0, %v3575_v11 }
 0xf33   :  { %3576 = vrcp.f32 %v1223_v51 }
 0xf3d   :  { %v3577_v52 = vpop.eup %3576 }
 0xf3e   :  { %v1227_v14 = vmul.f32 %v3577_v52, %v1137_v41 }
 0xfa1   :  { %v1230_v53 = vpop.permute.xlu1 %1229 }
 0xfa2   :  { %v1232_v54 = vmul.f32 %v3577_v52, %v1230_v53 }
 0xfa4   :  { %1234 = vrot.lane.b32.xlu0 %v1232_v54, %s3691_s9 }
0x1016   :  { %v1235_v55 = vpop.permute.xlu0 %1234 }
0x1017   :  { %v1237_v56 = vadd.f32 %v1235_v55, %v1227_v14 }
0x1019   :  { %3578 = vtanh.f32 %v1237_v56 }
0x1023   :  { %v3579_v57 = vpop.eup %3578 }
0x1024   :  { %1240 = vrot.lane.b32.xlu1 %v3579_v57, %s3692_s0 }
0x1096   :  { %v1241_v58 = vpop.permute.xlu1 %1240 }
0x1097   :  { %v1243_v59 = vmul.f32 %v3577_v52, %v1241_v58 }
0x1099   :  { %1245 = vrot.lane.b32.xlu0 %v1243_v59, %s3691_s9  ;;  %v45_v59 = vld [vmem:[%s4089_s3] sm:$0xff] }
0x110b   :  { %v1246_v60 = vpop.permute.xlu0 %1245 }
0x110c   :  { %3233 = vmatmul.mubr.msk.f32.vlgmr.msra.gmra.mrb[6].mxu0 %vm645_vm2, %v1246_v60  ;;  %v46_v60 = vld [vmem:[%s4089_s3 + $0x8] sm:$0xff] }
0x110d   :  { %3254 = vmatprep.mubr.msk.f32.mxu0 %vm3688_vm0, %v3689_v1 }
0x11df   :  { %v1315_v61 = vpop.f32.mrb[6].mxu0 }
0x11e0   :  { %v3501_v62 = vadd.f32 %v3812_v15, %v1315_v61  ;;  %v3234_v63 = vpop.f32.mrb[7].mxu0  ;;  %v3950_v61 = vpack.c.bf16 %v46_v60, %v45_v59 }
0x11e2   :  { %3580 = vtanh.f32 %v3501_v62  ;;  %v2956_v3 = vmul.f32 -1.442695, %v3501_v62 }
0x11e4   :  { %3582 = vpow2.f32 %v2956_v3 }
0x11ec   :  { %v3581_v2 = vpop.eup %3580 }
0x11ed   :  { %1329 = vrot.lane.b32.xlu1 %v3581_v2, %s3692_s0 }
0x11ee   :  { %v3583_v4 = vpop.eup %3582 }
0x11ef   :  { %v1323_v5 = vadd.f32 1.0, %v3583_v4 }
0x11f1   :  { %3584 = vrcp.f32 %v1323_v5 }
0x11fb   :  { %v3585_v6 = vpop.eup %3584 }
0x11fc   :  { %v1327_v9 = vmul.f32 %v3585_v6, %v1237_v56 }
0x125f   :  { %v1330_v7 = vpop.permute.xlu1 %1329 }
0x1260   :  { %v1332_v8 = vmul.f32 %v3585_v6, %v1330_v7 }
0x1262   :  { %1334 = vrot.lane.b32.xlu0 %v1332_v8, %s3691_s9 }
0x12d4   :  { %v1335_v10 = vpop.permute.xlu0 %1334 }
0x12d5   :  { %v1337_v12 = vadd.f32 %v1335_v10, %v1327_v9 }
0x12d7   :  { %3586 = vtanh.f32 %v1337_v12 }
0x12e1   :  { %v3587_v13 = vpop.eup %3586 }
0x12e2   :  { %1340 = vrot.lane.b32.xlu1 %v3587_v13, %s3692_s0 }
0x1354   :  { %v1341_v16 = vpop.permute.xlu1 %1340 }
0x1355   :  { %v1343_v17 = vmul.f32 %v3585_v6, %v1341_v16 }
0x1357   :  { %1345 = vrot.lane.b32.xlu0 %v1343_v17, %s3691_s9 }
0x13c9   :  { %v1346_v18 = vpop.permute.xlu0 %1345 }
0x13ca   :  { %3244 = vmatmul.mubr.msk.f32.vlgmr.msra.gmra.mrb[6].mxu1 %vm645_vm2, %v1346_v18 }
0x13cb   :  { %3261 = vmatprep.mubr.msk.f32.mxu1 %vm3688_vm0, %v3689_v1  ;;  %3449 = vmatpush3.bf16.msra.mxu1 %v3923_v38 }
0x13cc   :  { %3450 = vmatprep.subr.bf16.mxu1 %v3687_v0 }
0x13ce   :  { %3262 = vmatmul.mubr.f32.vlgmr.msra.gmra.mrb[8].mxu1 %v3689_v1 }
0x13cf   :  { %3268 = vmatprep.mubr.msk.f32.mxu1 %vm3688_vm0, %v3689_v1  ;;  %3452 = vmatpush3.bf16.msra.mxu1 %v3950_v61 }
0x13d0   :  { %3456 = vmatprep.subr.bf16.mxu1 %v3687_v0 }
0x149d   :  { %v1415_v19 = vpop.f32.mrb[6].mxu1 }
0x149e   :  { %v3502_v20 = vadd.f32 %v3812_v15, %v1415_v19  ;;  %v3245_v21 = vpop.f32.mrb[7].mxu1  ;;  %v38_v15 = vld [vmem:[#allocation2] sm:$0xff] }
0x149f   :  { %v3442_v34 = vpack.c.bf16 %v39_v32, %v38_v15 }
0x14a0   :  { %3588 = vtanh.f32 %v3502_v20  ;;  %v2958_v23 = vmul.f32 -1.442695, %v3502_v20 }
0x14a1   :  { %3443 = vmatpush3.bf16.msra.mxu0 %v3442_v34  ;;  %v1591_v44 = vpop.f32.mrb[8].mxu1 }
0x14a2   :  { %3590 = vpow2.f32 %v2958_v23  ;;  %3444 = vmatprep.subr.bf16.mxu0 %v3687_v0  ;;  %v3263_v45 = vpop.f32.mrb[9].mxu1 }
0x14a5   :  { %3446 = vmatpush3.bf16.msra.mxu0 %v3445_v39 }
0x14a6   :  { %3453 = vmatprep.subr.bf16.mxu0 %v3687_v0 }
0x14aa   :  { %v3589_v22 = vpop.eup %3588 }
0x14ab   :  { %1429 = vrot.lane.b32.xlu1 %v3589_v22, %s3692_s0 }
0x14ac   :  { %v3591_v24 = vpop.eup %3590 }
0x14ad   :  { %v1423_v25 = vadd.f32 1.0, %v3591_v24 }
0x14af   :  { %3592 = vrcp.f32 %v1423_v25 }
0x14b9   :  { %v3593_v26 = vpop.eup %3592 }
0x14ba   :  { %v1427_v29 = vmul.f32 %v3593_v26, %v1337_v12 }
0x151d   :  { %v1430_v27 = vpop.permute.xlu1 %1429 }
0x151e   :  { %v1432_v28 = vmul.f32 %v3593_v26, %v1430_v27 }
0x1520   :  { %1434 = vrot.lane.b32.xlu0 %v1432_v28, %s3691_s9 }
0x1592   :  { %v1435_v30 = vpop.permute.xlu0 %1434 }
0x1593   :  { %v1437_v31 = vadd.f32 %v1435_v30, %v1427_v29 }
0x1595   :  { %3594 = vtanh.f32 %v1437_v31 }
0x159f   :  { %v3595_v40 = vpop.eup %3594 }
0x15a0   :  { %1440 = vrot.lane.b32.xlu1 %v3595_v40, %s3692_s0 }
0x1612   :  { %v1441_v41 = vpop.permute.xlu1 %1440 }
0x1613   :  { %v1443_v42 = vmul.f32 %v3593_v26, %v1441_v41 }
0x1615   :  { %1449 = vrot.lane.b32.xlu0 %v1443_v42, %s3691_s9 }
0x1687   :  { %v1450_v43 = vpop.permute.xlu0 %1449 }
0x1688   :  { %3255 = vmatmul.mubr.msk.f32.vlgmr.msra.gmra.mrb[8].mxu0 %vm645_vm2, %v1450_v43 }
0x1689   :  { %3455 = vmatpush3.bf16.msra.mxu0 %v3923_v38  ;;  %3275 = vmatprep.mubr.msk.f32.mxu0 %vm3688_vm0, %v3689_v1 }
0x168a   :  { %3459 = vmatprep.subr.bf16.mxu0 %v3687_v0 }
0x175b   :  { %v1519_v47 = vpop.f32.mrb[8].mxu0 }
0x175c   :  { %v3939_v48 = vadd.f32 %v2959_v46, %v1519_v47  ;;  %v3256_v49 = vpop.f32.mrb[9].mxu0 }
0x175e   :  { %v1595_v50 = vadd.f32 %v1591_v44, %v3939_v48 }
0x1760   :  { %3596 = vtanh.f32 %v1595_v50  ;;  %v2961_v51 = vmul.f32 -1.442695, %v1595_v50 }
0x1762   :  { %3598 = vpow2.f32 %v2961_v51 }
0x176a   :  { %v3597_v11 = vpop.eup %3596 }
0x176b   :  { %1605 = vrot.lane.b32.xlu1 %v3597_v11, %s3690_s8 }
0x176c   :  { %v3599_v52 = vpop.eup %3598 }
0x176d   :  { %v1599_v53 = vadd.f32 1.0, %v3599_v52 }
0x176f   :  { %3600 = vrcp.f32 %v1599_v53 }
0x1779   :  { %v3601_v54 = vpop.eup %3600 }
0x177a   :  { %v1603_v56 = vmul.f32 0.0, %v3601_v54 }
0x17dd   :  { %v1606_v14 = vpop.permute.xlu1 %1605 }
0x17de   :  { %v1608_v55 = vmul.f32 %v3601_v54, %v1606_v14 }
0x17e0   :  { %1610 = vrot.lane.b32.xlu0 %v1608_v55, %s3696_s22 }
0x1852   :  { %v1611_v57 = vpop.permute.xlu0 %1610 }
0x1853   :  { %v1613_v58 = vadd.f32 %v1611_v57, %v1603_v56 }
0x1855   :  { %3602 = vtanh.f32 %v1613_v58 }
0x185f   :  { %v3603_v62 = vpop.eup %3602 }
0x1860   :  { %1616 = vrot.lane.b32.xlu1 %v3603_v62, %s3691_s9 }
0x18d2   :  { %v1617_v63 = vpop.permute.xlu1 %1616 }
0x18d3   :  { %v1619_v2 = vmul.f32 %v3601_v54, %v1617_v63 }
0x18d5   :  { %1625 = vrot.lane.b32.xlu0 %v1619_v2, %s3695_s21 }
0x1947   :  { %v1626_v3 = vpop.permute.xlu0 %1625 }
0x1948   :  { %3269 = vmatmul.mubr.msk.f32.vlgmr.msra.gmra.mrb[10].mxu1 %vm53_vm1, %v1626_v3  ;;  %3276 = vmatmul.mubr.msk.f32.vlgmr.msra.gmra.mrb[10].mxu0 %vm53_vm1, %v1626_v3 }
0x1949   :  { %3461 = vmatpush3.bf16.msra.mxu0 %v3923_v38  ;;  %3458 = vmatpush3.bf16.msra.mxu1 %v3950_v61 }
0x194a   :  { %3282 = vmatprep.mubr.msk.f32.mxu1 %vm3688_vm0, %v3689_v1  ;;  %3289 = vmatprep.mubr.msk.f32.mxu0 %vm3688_vm0, %v3689_v1 }
0x194b   :  { %3465 = vmatprep.subr.bf16.mxu0 %v3687_v0  ;;  %3462 = vmatprep.subr.bf16.mxu1 %v3687_v0 }
0x1a1b   :  { %v3966_v4 = vpop.f32.mrb[10].mxu1  ;;  %v1765_v5 = vpop.f32.mrb[10].mxu0 }
0x1a1c   :  { %v1769_v6 = vadd.f32 %v1765_v5, %v3939_v48  ;;  %v3270_v7 = vpop.f32.mrb[11].mxu1  ;;  %v3277_v8 = vpop.f32.mrb[11].mxu0 }
0x1a1e   :  { %3604 = vtanh.f32 %v1769_v6  ;;  %v2965_v10 = vmul.f32 -1.442695, %v1769_v6 }
0x1a20   :  { %3606 = vpow2.f32 %v2965_v10 }
0x1a28   :  { %v3605_v9 = vpop.eup %3604 }
0x1a29   :  { %1779 = vrot.lane.b32.xlu1 %v3605_v9, %s3690_s8 }
0x1a2a   :  { %v3607_v12 = vpop.eup %3606 }
0x1a2b   :  { %v1773_v13 = vadd.f32 1.0, %v3607_v12 }
0x1a2d   :  { %3608 = vrcp.f32 %v1773_v13 }
0x1a37   :  { %v3609_v16 = vpop.eup %3608 }
0x1a38   :  { %v1777_v19 = vmul.f32 %v3609_v16, %v1613_v58 }
0x1a9b   :  { %v1780_v17 = vpop.permute.xlu1 %1779 }
0x1a9c   :  { %v1782_v18 = vmul.f32 %v3609_v16, %v1780_v17 }
0x1a9e   :  { %1784 = vrot.lane.b32.xlu0 %v1782_v18, %s3696_s22 }
0x1b10   :  { %v1785_v20 = vpop.permute.xlu0 %1784 }
0x1b11   :  { %v1787_v21 = vadd.f32 %v1785_v20, %v1777_v19 }
0x1b13   :  { %3610 = vtanh.f32 %v1787_v21 }
0x1b1d   :  { %v3611_v22 = vpop.eup %3610 }
0x1b1e   :  { %1790 = vrot.lane.b32.xlu1 %v3611_v22, %s3691_s9 }
0x1b90   :  { %v1791_v23 = vpop.permute.xlu1 %1790 }
0x1b91   :  { %v1793_v24 = vmul.f32 %v3609_v16, %v1791_v23 }
0x1b93   :  { %1795 = vrot.lane.b32.xlu0 %v1793_v24, %s3695_s21 }
0x1c05   :  { %v1796_v25 = vpop.permute.xlu0 %1795 }
0x1c06   :  { %3283 = vmatmul.mubr.msk.f32.vlgmr.msra.gmra.mrb[12].mxu1 %vm53_vm1, %v1796_v25  ;;  %3290 = vmatmul.mubr.msk.f32.vlgmr.msra.gmra.mrb[12].mxu0 %vm53_vm1, %v1796_v25 }
0x1c07   :  { %3467 = vmatpush3.bf16.msra.mxu0 %v3923_v38  ;;  %3464 = vmatpush3.bf16.msra.mxu1 %v3950_v61 }
0x1c08   :  { %3296 = vmatprep.mubr.msk.f32.mxu1 %vm3688_vm0, %v3689_v1  ;;  %3303 = vmatprep.mubr.msk.f32.mxu0 %vm3688_vm0, %v3689_v1 }
0x1c09   :  { %3471 = vmatprep.subr.bf16.mxu0 %v3687_v0  ;;  %3468 = vmatprep.subr.bf16.mxu1 %v3687_v0 }
0x1cd9   :  { %v3983_v26 = vpop.f32.mrb[12].mxu1  ;;  %v1935_v27 = vpop.f32.mrb[12].mxu0 }
0x1cda   :  { %v1939_v28 = vadd.f32 %v1935_v27, %v3939_v48  ;;  %v3284_v29 = vpop.f32.mrb[13].mxu1  ;;  %v3291_v30 = vpop.f32.mrb[13].mxu0 }
0x1cdc   :  { %3612 = vtanh.f32 %v1939_v28  ;;  %v2968_v15 = vmul.f32 -1.442695, %v1939_v28 }
0x1cde   :  { %3614 = vpow2.f32 %v2968_v15 }
0x1ce6   :  { %v3613_v31 = vpop.eup %3612 }
0x1ce7   :  { %1949 = vrot.lane.b32.xlu1 %v3613_v31, %s3690_s8 }
0x1ce8   :  { %v3615_v32 = vpop.eup %3614 }
0x1ce9   :  { %v1943_v33 = vadd.f32 1.0, %v3615_v32 }
0x1ceb   :  { %3616 = vrcp.f32 %v1943_v33 }
0x1cf5   :  { %v3617_v34 = vpop.eup %3616 }
0x1cf6   :  { %v1947_v37 = vmul.f32 %v3617_v34, %v1787_v21 }
0x1d59   :  { %v1950_v35 = vpop.permute.xlu1 %1949 }
0x1d5a   :  { %v1952_v36 = vmul.f32 %v3617_v34, %v1950_v35 }
0x1d5c   :  { %1954 = vrot.lane.b32.xlu0 %v1952_v36, %s3696_s22 }
0x1dce   :  { %v1955_v39 = vpop.permute.xlu0 %1954 }
0x1dcf   :  { %v1957_v40 = vadd.f32 %v1955_v39, %v1947_v37 }
0x1dd1   :  { %3618 = vtanh.f32 %v1957_v40 }
0x1ddb   :  { %v3619_v41 = vpop.eup %3618 }
0x1ddc   :  { %1960 = vrot.lane.b32.xlu1 %v3619_v41, %s3691_s9 }
0x1e4e   :  { %v1961_v42 = vpop.permute.xlu1 %1960 }
0x1e4f   :  { %v1963_v43 = vmul.f32 %v3617_v34, %v1961_v42 }
0x1e51   :  { %1965 = vrot.lane.b32.xlu0 %v1963_v43, %s3695_s21 }
0x1ec3   :  { %v1966_v44 = vpop.permute.xlu0 %1965 }
0x1ec4   :  { %3297 = vmatmul.mubr.msk.f32.vlgmr.msra.gmra.mrb[14].mxu1 %vm53_vm1, %v1966_v44  ;;  %3304 = vmatmul.mubr.msk.f32.vlgmr.msra.gmra.mrb[14].mxu0 %vm53_vm1, %v1966_v44 }
0x1ec5   :  { %3473 = vmatpush3.bf16.msra.mxu0 %v3923_v38  ;;  %3470 = vmatpush3.bf16.msra.mxu1 %v3950_v61 }
0x1ec6   :  { %3310 = vmatprep.mubr.msk.f32.mxu1 %vm3688_vm0, %v3689_v1  ;;  %3317 = vmatprep.mubr.msk.f32.mxu0 %vm3688_vm0, %v3689_v1 }
0x1ec7   :  { %3477 = vmatprep.subr.bf16.mxu0 %v3687_v0  ;;  %3474 = vmatprep.subr.bf16.mxu1 %v3687_v0 }
0x1f97   :  { %v4000_v45 = vpop.f32.mrb[14].mxu1  ;;  %v2105_v46 = vpop.f32.mrb[14].mxu0 }
0x1f98   :  { %v2109_v47 = vadd.f32 %v2105_v46, %v3939_v48  ;;  %v3298_v49 = vpop.f32.mrb[15].mxu1  ;;  %v3305_v50 = vpop.f32.mrb[15].mxu0 }
0x1f9a   :  { %3620 = vtanh.f32 %v2109_v47  ;;  %v2971_v51 = vmul.f32 -1.442695, %v2109_v47 }
0x1f9c   :  { %3622 = vpow2.f32 %v2971_v51 }
0x1fa4   :  { %v3621_v11 = vpop.eup %3620 }
0x1fa5   :  { %2119 = vrot.lane.b32.xlu1 %v3621_v11, %s3690_s8 }
0x1fa6   :  { %v3623_v52 = vpop.eup %3622 }
0x1fa7   :  { %v2113_v53 = vadd.f32 1.0, %v3623_v52 }
0x1fa9   :  { %3624 = vrcp.f32 %v2113_v53 }
0x1fb3   :  { %v3625_v54 = vpop.eup %3624 }
0x1fb4   :  { %v2117_v56 = vmul.f32 %v3625_v54, %v1957_v40 }
0x2017   :  { %v2120_v14 = vpop.permute.xlu1 %2119 }
0x2018   :  { %v2122_v55 = vmul.f32 %v3625_v54, %v2120_v14 }
0x201a   :  { %2124 = vrot.lane.b32.xlu0 %v2122_v55, %s3696_s22 }
0x208c   :  { %v2125_v57 = vpop.permute.xlu0 %2124 }
0x208d   :  { %v2127_v58 = vadd.f32 %v2125_v57, %v2117_v56 }
0x208f   :  { %3626 = vtanh.f32 %v2127_v58 }
0x2099   :  { %v3627_v59 = vpop.eup %3626 }
0x209a   :  { %2130 = vrot.lane.b32.xlu1 %v3627_v59, %s3691_s9 }
0x210c   :  { %v2131_v60 = vpop.permute.xlu1 %2130 }
0x210d   :  { %v2133_v62 = vmul.f32 %v3625_v54, %v2131_v60 }
0x210f   :  { %2135 = vrot.lane.b32.xlu0 %v2133_v62, %s3695_s21 }
0x2181   :  { %v2136_v63 = vpop.permute.xlu0 %2135 }
0x2182   :  { %3311 = vmatmul.mubr.msk.f32.vlgmr.msra.gmra.mrb[16].mxu1 %vm53_vm1, %v2136_v63  ;;  %3318 = vmatmul.mubr.msk.f32.vlgmr.msra.gmra.mrb[16].mxu0 %vm53_vm1, %v2136_v63 }
0x2183   :  { %3479 = vmatpush3.bf16.msra.mxu0 %v3923_v38  ;;  %3476 = vmatpush3.bf16.msra.mxu1 %v3950_v61 }
0x2184   :  { %3324 = vmatprep.mubr.msk.f32.mxu1 %vm3688_vm0, %v3689_v1  ;;  %3331 = vmatprep.mubr.msk.f32.mxu0 %vm3688_vm0, %v3689_v1 }
0x2185   :  { %3483 = vmatprep.subr.bf16.mxu0 %v3687_v0  ;;  %3480 = vmatprep.subr.bf16.mxu1 %v3687_v0 }
0x2255   :  { %v4017_v2 = vpop.f32.mrb[16].mxu1  ;;  %v2275_v3 = vpop.f32.mrb[16].mxu0 }
0x2256   :  { %v2279_v5 = vadd.f32 %v2275_v3, %v3939_v48  ;;  %v3312_v6 = vpop.f32.mrb[17].mxu1  ;;  %v3319_v7 = vpop.f32.mrb[17].mxu0 }
0x2258   :  { %3628 = vtanh.f32 %v2279_v5  ;;  %v2974_v9 = vmul.f32 -1.442695, %v2279_v5 }
0x225a   :  { %3630 = vpow2.f32 %v2974_v9 }
0x2262   :  { %v3629_v8 = vpop.eup %3628 }
0x2263   :  { %2289 = vrot.lane.b32.xlu1 %v3629_v8, %s3690_s8 }
0x2264   :  { %v3631_v10 = vpop.eup %3630 }
0x2265   :  { %v2283_v12 = vadd.f32 1.0, %v3631_v10 }
0x2267   :  { %3632 = vrcp.f32 %v2283_v12 }
0x2271   :  { %v3633_v13 = vpop.eup %3632 }
0x2272   :  { %v2287_v18 = vmul.f32 %v3633_v13, %v2127_v58 }
0x22d5   :  { %v2290_v16 = vpop.permute.xlu1 %2289 }
0x22d6   :  { %v2292_v17 = vmul.f32 %v3633_v13, %v2290_v16 }
0x22d8   :  { %2294 = vrot.lane.b32.xlu0 %v2292_v17, %s3696_s22 }
0x234a   :  { %v2295_v19 = vpop.permute.xlu0 %2294 }
0x234b   :  { %v2297_v20 = vadd.f32 %v2295_v19, %v2287_v18  ;;  %v2962_v19 = vld [vmem:[%s4089_s3 + $0x10] ss:$0 sm:$0xff] }
0x234d   :  { %3634 = vtanh.f32 %v2297_v20 }
0x2357   :  { %v3635_v21 = vpop.eup %3634 }
0x2358   :  { %2300 = vrot.lane.b32.xlu1 %v3635_v21, %s3691_s9  ;;  %v2206_v21 = vadd.f32 %v2962_v19, %v4017_v2 }
0x23ca   :  { %v2301_v22 = vpop.permute.xlu1 %2300 }
0x23cb   :  { %v2303_v23 = vmul.f32 %v3633_v13, %v2301_v22 }
0x23cd   :  { %2305 = vrot.lane.b32.xlu0 %v2303_v23, %s3695_s21 }
0x243f   :  { %v2306_v24 = vpop.permute.xlu0 %2305 }
0x2440   :  { %3325 = vmatmul.mubr.msk.f32.vlgmr.msra.gmra.mrb[18].mxu1 %vm53_vm1, %v2306_v24  ;;  %3332 = vmatmul.mubr.msk.f32.vlgmr.msra.gmra.mrb[18].mxu0 %vm53_vm1, %v2306_v24 }
0x2441   :  { %3485 = vmatpush3.bf16.msra.mxu0 %v3923_v38  ;;  %3482 = vmatpush3.bf16.msra.mxu1 %v3950_v61 }
0x2442   :  { %3338 = vmatprep.mubr.msk.f32.mxu1 %vm3688_vm0, %v3689_v1  ;;  %3345 = vmatprep.mubr.msk.f32.mxu0 %vm3688_vm0, %v3689_v1 }
0x2443   :  { %3489 = vmatprep.subr.bf16.mxu0 %v3687_v0  ;;  %3486 = vmatprep.subr.bf16.mxu1 %v3687_v0 }
0x2513   :  { %v4034_v25 = vpop.f32.mrb[18].mxu1  ;;  %v2445_v27 = vpop.f32.mrb[18].mxu0 }
0x2514   :  { %v2449_v28 = vadd.f32 %v2445_v27, %v3939_v48  ;;  %v3326_v29 = vpop.f32.mrb[19].mxu1  ;;  %v3333_v30 = vpop.f32.mrb[19].mxu0  ;;  %v2036_v27 = vadd.f32 %v2962_v19, %v4000_v45  ;;  %v1696_v45 = vadd.f32 %v2962_v19, %v3966_v4 }
0x2516   :  { %3636 = vtanh.f32 %v2449_v28  ;;  %v2977_v15 = vmul.f32 -1.442695, %v2449_v28  ;;  %v2376_v28 = vadd.f32 %v2962_v19, %v4034_v25 }
0x2518   :  { %3638 = vpow2.f32 %v2977_v15 }
0x2520   :  { %v3637_v31 = vpop.eup %3636 }
0x2521   :  { %2459 = vrot.lane.b32.xlu1 %v3637_v31, %s3690_s8 }
0x2522   :  { %v3639_v32 = vpop.eup %3638 }
0x2523   :  { %v2453_v33 = vadd.f32 1.0, %v3639_v32 }
0x2525   :  { %3640 = vrcp.f32 %v2453_v33 }
0x252f   :  { %v3641_v34 = vpop.eup %3640 }
0x2530   :  { %v2457_v37 = vmul.f32 %v3641_v34, %v2297_v20  ;;  %v1866_v20 = vadd.f32 %v2962_v19, %v3983_v26 }
0x2593   :  { %v2460_v35 = vpop.permute.xlu1 %2459 }
0x2594   :  { %v2462_v36 = vmul.f32 %v3641_v34, %v2460_v35 }
0x2596   :  { %2464 = vrot.lane.b32.xlu0 %v2462_v36, %s3696_s22 }
0x2608   :  { %v2465_v39 = vpop.permute.xlu0 %2464 }
0x2609   :  { %v2467_v40 = vadd.f32 %v2465_v39, %v2457_v37 }
0x260b   :  { %3642 = vtanh.f32 %v2467_v40 }
0x2615   :  { %v3643_v41 = vpop.eup %3642 }
0x2616   :  { %2470 = vrot.lane.b32.xlu1 %v3643_v41, %s3691_s9 }
0x2688   :  { %v2471_v42 = vpop.permute.xlu1 %2470 }
0x2689   :  { %v2473_v43 = vmul.f32 %v3641_v34, %v2471_v42 }
0x268b   :  { %2475 = vrot.lane.b32.xlu0 %v2473_v43, %s3695_s21 }
0x26fd   :  { %v2476_v44 = vpop.permute.xlu0 %2475 }
0x26fe   :  { %3339 = vmatmul.mubr.msk.f32.vlgmr.msra.gmra.mrb[20].mxu1 %vm53_vm1, %v2476_v44  ;;  %3346 = vmatmul.mubr.msk.f32.vlgmr.msra.gmra.mrb[20].mxu0 %vm53_vm1, %v2476_v44 }
0x26ff   :  { %3491 = vmatpush3.bf16.msra.mxu0 %v3923_v38  ;;  %3488 = vmatpush3.bf16.msra.mxu1 %v3950_v61 }
0x2700   :  { %3352 = vmatprep.mubr.msk.f32.mxu1 %vm3688_vm0, %v3689_v1  ;;  %3359 = vmatprep.mubr.msk.f32.mxu0 %vm3688_vm0, %v3689_v1 }
0x2701   :  { %3492 = vmatprep.subr.bf16.mxu1 %v3687_v0 }
0x27d1   :  { %v2545_v46 = vpop.f32.mrb[20].mxu1  ;;  %v2615_v47 = vpop.f32.mrb[20].mxu0 }
0x27d2   :  { %v2619_v49 = vadd.f32 %v2615_v47, %v3939_v48  ;;  %v3340_v50 = vpop.f32.mrb[21].mxu1  ;;  %v3347_v11 = vpop.f32.mrb[21].mxu0  ;;  %v2546_v22 = vadd.f32 %v2962_v19, %v2545_v46 }
0x27d4   :  { %3644 = vtanh.f32 %v2619_v49  ;;  %v2980_v38 = vmul.f32 -1.442695, %v2619_v49 }
0x27d6   :  { %3646 = vpow2.f32 %v2980_v38 }
0x27de   :  { %v3645_v51 = vpop.eup %3644 }
0x27df   :  { %2629 = vrot.lane.b32.xlu1 %v3645_v51, %s3690_s8 }
0x27e0   :  { %v3647_v52 = vpop.eup %3646 }
0x27e1   :  { %v2623_v53 = vadd.f32 1.0, %v3647_v52 }
0x27e3   :  { %3648 = vrcp.f32 %v2623_v53 }
0x27ed   :  { %v3649_v54 = vpop.eup %3648 }
0x27ee   :  { %v2627_v0 = vmul.f32 %v3649_v54, %v2467_v40 }
0x2851   :  { %v2630_v14 = vpop.permute.xlu1 %2629 }
0x2852   :  { %v2632_v55 = vmul.f32 %v3649_v54, %v2630_v14 }
0x2854   :  { %2634 = vrot.lane.b32.xlu0 %v2632_v55, %s3696_s22 }
0x28c6   :  { %v2635_v56 = vpop.permute.xlu0 %2634 }
0x28c7   :  { %v2637_v57 = vadd.f32 %v2635_v56, %v2627_v0 }
0x28c9   :  { %3650 = vtanh.f32 %v2637_v57 }
0x28d3   :  { %v3651_v58 = vpop.eup %3650 }
0x28d4   :  { %2640 = vrot.lane.b32.xlu1 %v3651_v58, %s3691_s9 }
0x2946   :  { %v2641_v59 = vpop.permute.xlu1 %2640 }
0x2947   :  { %v2643_v60 = vmul.f32 %v3649_v54, %v2641_v59 }
0x2949   :  { %2645 = vrot.lane.b32.xlu0 %v2643_v60, %s3695_s21 }
0x29bb   :  { %v2646_v62 = vpop.permute.xlu0 %2645 }
0x29bc   :  { %3353 = vmatmul.mubr.msk.f32.vlgmr.msra.gmra.mrb[22].mxu1 %vm53_vm1, %v2646_v62  ;;  %3360 = vmatmul.mubr.msk.f32.vlgmr.msra.gmra.mrb[22].mxu0 %vm53_vm1, %v2646_v62 }
0x29bd   :  { %3494 = vmatpush3.bf16.msra.mxu1 %v3950_v61  ;;  %3366 = vmatprep.mubr.msk.f32.mxu1 %vm3688_vm0, %v3689_v1 }
0x2a8f   :  { %v2715_v63 = vpop.f32.mrb[22].mxu1  ;;  %v2785_v3 = vpop.f32.mrb[22].mxu0 }
0x2a90   :  { %v2789_v5 = vadd.f32 %v2785_v3, %v3939_v48  ;;  %v3354_v6 = vpop.f32.mrb[23].mxu1  ;;  %v3361_v7 = vpop.f32.mrb[23].mxu0  ;;  %v2716_v26 = vadd.f32 %v2962_v19, %v2715_v63 }
0x2a92   :  { %3652 = vtanh.f32 %v2789_v5  ;;  %v2983_v9 = vmul.f32 -1.442695, %v2789_v5 }
0x2a94   :  { %3654 = vpow2.f32 %v2983_v9 }
0x2a9c   :  { %v3653_v8 = vpop.eup %3652 }
0x2a9d   :  { %2799 = vrot.lane.b32.xlu1 %v3653_v8, %s3690_s8 }
0x2a9e   :  { %v3655_v10 = vpop.eup %3654 }
0x2a9f   :  { %v2793_v12 = vadd.f32 1.0, %v3655_v10 }
0x2aa1   :  { %3656 = vrcp.f32 %v2793_v12 }
0x2aab   :  { %v3657_v13 = vpop.eup %3656 }
0x2aac   :  { %v2797_v1 = vmul.f32 %v3657_v13, %v2637_v57 }
0x2b0f   :  { %v2800_v61 = vpop.permute.xlu1 %2799 }
0x2b10   :  { %v2802_v16 = vmul.f32 %v3657_v13, %v2800_v61 }
0x2b12   :  { %2804 = vrot.lane.b32.xlu0 %v2802_v16, %s3696_s22 }
0x2b84   :  { %v2805_v17 = vpop.permute.xlu0 %2804 }
0x2b85   :  { %v2807_v18 = vadd.f32 %v2805_v17, %v2797_v1 }
0x2b87   :  { %3658 = vtanh.f32 %v2807_v18 }
0x2b91   :  { %v3659_v48 = vpop.eup %3658 }
0x2b92   :  { %2810 = vrot.lane.b32.xlu1 %v3659_v48, %s3691_s9 }
0x2b96   :  { %2890 = vrot.lane.b32.xlu1 %v1866_v20, %s3696_s22 }
0x2b9a   :  { %2898 = vrot.lane.b32.xlu1 %v2206_v21, %s3694_s20 }
0x2b9e   :  { %2906 = vrot.lane.b32.xlu1 %v2546_v22, %s3695_s21 }
0x2c04   :  { %v2811_v23 = vpop.permute.xlu1 %2810 }
0x2c05   :  { %v2813_v24 = vmul.f32 %v3657_v13, %v2811_v23 }
0x2c07   :  { %2815 = vrot.lane.b32.xlu0 %v2813_v24, %s3695_s21 }
0x2c08   :  { %v2891_v15 = vpop.permute.xlu1 %2890 }
0x2c09   :  { %v2917_v25 = vsel %vm53_vm1, %v1696_v45, %v2891_v15 }
0x2c0b   :  { %2894 = vrot.lane.b32.xlu0 %v2036_v27, %s3691_s9 }
0x2c0c   :  { %v2899_v33 = vpop.permute.xlu1 %2898 }
0x2c0f   :  { %2902 = vrot.lane.b32.xlu0 %v2376_v28, %s3692_s0 }
0x2c10   :  { %v2907_v37 = vpop.permute.xlu1 %2906 }
0x2c13   :  { %2910 = vrot.lane.b32.xlu0 %v2716_v26, %s3690_s8 }
0x2c79   :  { %v2816_v2 = vpop.permute.xlu0 %2815 }
0x2c7a   :  { %3367 = vmatmul.mubr.msk.f32.vlgmr.msra.gmra.mrb[24].mxu1 %vm53_vm1, %v2816_v2 }
0x2c7d   :  { %v2895_v32 = vpop.permute.xlu0 %2894 }
0x2c7e   :  { %v2918_v35 = vsel %vm645_vm2, %v2917_v25, %v2895_v32 }
0x2c7f   :  { %v2920_v36 = vsel %vm2919_vm3, %v2918_v35, %v2899_v33 }
0x2c81   :  { %v2903_v34 = vpop.permute.xlu0 %2902 }
0x2c82   :  { %v2922_v39 = vsel %vm2921_vm4, %v2920_v36, %v2903_v34 }
0x2c83   :  { %v2924_v41 = vsel %vm2923_vm5, %v2922_v39, %v2907_v37 }
0x2c85   :  { %v2911_v40 = vpop.permute.xlu0 %2910 }
0x2c86   :  { %v2926_v42 = vsel %vm2925_vm6, %v2924_v41, %v2911_v40 }
0x2d4d   :  { %v2885_v29 = vpop.f32.mrb[24].mxu1 }
0x2d4e   :  { %v2886_v30 = vadd.f32 %v2962_v19, %v2885_v29  ;;  %v3368_v31 = vpop.f32.mrb[25].mxu1 }
0x2d50   :  { %2914 = vrot.lane.b32.xlu1 %v2886_v30, %s3693_s1 }
0x2dc2   :  { %v2915_v43 = vpop.permute.xlu1 %2914 }
0x2dc3   :  { %v2928_v44 = vsel %vm2927_vm7, %v2926_v42, %v2915_v43 }
0x2dc4   :  { %2929 = vst [vmem:[%s4090_s4] sm:$0x3] %v2928_v44 }
0x2dc5   :  { %2934 = vsyncpa [#allocation3], 1 }

</bundles_post_ra>
